<compile_context>
chip_gen: v7x
topology: tpu7x:2x2x1
jax: 0.10.0
libtpu: 0.0.40
codegen_flags: <defaults>
</compile_context>

<pallas_src>
import math

import jax
import jax.numpy as jnp
from jax.experimental import pallas as pl
from jax.experimental.pallas import tpu as pltpu

FC1 = 512
FC2 = 1024


def _round_up(x: int, m: int) -> int:
    return ((x + m - 1) // m) * m


def _choose_tiling(batch: int, tm_max: int) -> tuple[int, int]:
    """Pick (tile_rows, padded_batch).

    Minimizes zero-row padding (tile = round_up(cdiv(B, n_tiles), 16)),
    and forces an even number (>= 2) of grid steps when the batch is large
    enough so the "parallel" batch axis spans both v7x TensorCores.
    Rows are a multiple of 16 so bf16 slabs are sublane-aligned.
    """
    n_tiles = max(pl.cdiv(batch, tm_max), 1)
    if batch >= 32:
        n_tiles = max(n_tiles, 2)
        if n_tiles % 2:
            n_tiles += 1           # even step count -> balanced megacore split
    tm = _round_up(pl.cdiv(batch, n_tiles), 16)
    return tm, n_tiles * tm


def critic_kernel(x_ref,
                  w1_ref, b1_ref,
                  w2_ref, b2_ref,
                  w3_ref, b3_ref,
                  w4_ref, b4_ref,
                  out_ref):
    """Fused 4-layer MLP on one (TM, K) bf16 batch slab. f32 accumulation."""
    # Layer 1: bf16 MXU matmul, f32 acc, bias+ReLU in f32, single bf16
    # materialization of the activation feeding the next matmul.
    h1 = jnp.dot(x_ref[...], w1_ref[...], preferred_element_type=jnp.float32)
    h1 = jnp.maximum(h1 + b1_ref[...], 0.0).astype(jnp.bfloat16)

    # Layer 2.
    h2 = jnp.dot(h1, w2_ref[...], preferred_element_type=jnp.float32)
    h2 = jnp.maximum(h2 + b2_ref[...], 0.0).astype(jnp.bfloat16)

    # Layer 3 (kept f32: it feeds the VPU head reduce, not another matmul).
    h3 = jnp.dot(h2, w3_ref[...], preferred_element_type=jnp.float32)
    h3 = jnp.maximum(h3 + b3_ref[...], 0.0)

    # Head 512 -> 1: VPU broadcast-mul + XLU cross-lane reduce (no MXU,
    # no (512, 1) lane-padded weight layout).
    v = jnp.sum(h3 * w4_ref[...].astype(jnp.float32), axis=-1, keepdims=True)
    out_ref[...] = (v + b4_ref[...]).astype(out_ref.dtype)


def critic_forward(state, params, tm_max: int = 1024):
    """state: (B, input_dims) f32 -> value: (B, 1) f32."""
    (w1, b1), (w2, b2), (w3, b3), (w4, b4) = params
    B, K = state.shape

    # Stream the state slab in bf16 (halves HBM/VMEM bytes and removes the
    # per-step in-kernel pack); accumulation stays f32 inside the kernel.
    x = state.astype(jnp.bfloat16)

    # Pad K (layer-1 contraction dim) to a lane-aligned multiple of 128.
    k_pad = _round_up(K, 128)
    if k_pad != K:
        x = jnp.pad(x, ((0, 0), (0, k_pad - K)))
        w1 = jnp.pad(w1, ((0, k_pad - K), (0, 0)))

    # Batch tiling: large tiles, minimal zero-row padding, >=2 steps for v7x.
    tm, b_pad = _choose_tiling(B, tm_max)
    if b_pad != B:
        x = jnp.pad(x, ((0, b_pad - B), (0, 0)))

    grid = (b_pad // tm,)
    resident = lambda i: (0, 0)   # weights/biases: same VMEM block every step

    flops = 2 * b_pad * (k_pad * FC1 + FC1 * FC2 + FC2 * FC1 + FC1)
    bytes_accessed = (int(x.size) * x.dtype.itemsize
                      + sum(int(a.size) * a.dtype.itemsize
                            for a in (w1, b1, w2, b2, w3, b3, w4, b4))
                      + b_pad * 4)

    out = pl.pallas_call(
        critic_kernel,
        out_shape=jax.ShapeDtypeStruct((b_pad, 1), jnp.float32),
        grid=grid,
        in_specs=[
            pl.BlockSpec((tm, k_pad), lambda i: (i, 0)),   # state slab (pipelined)
            pl.BlockSpec(w1.shape, resident),
            pl.BlockSpec(b1.shape, resident),
            pl.BlockSpec(w2.shape, resident),
            pl.BlockSpec(b2.shape, resident),
            pl.BlockSpec(w3.shape, resident),
            pl.BlockSpec(b3.shape, resident),
            pl.BlockSpec(w4.shape, resident),
            pl.BlockSpec(b4.shape, resident),
        ],
        out_specs=pl.BlockSpec((tm, 1), lambda i: (i, 0)),
        compiler_params=pltpu.CompilerParams(
            dimension_semantics=("parallel",),
            vmem_limit_bytes=32 << 20),
        cost_estimate=pl.CostEstimate(
            flops=flops, transcendentals=0, bytes_accessed=bytes_accessed),
    )(x, w1, b1, w2, b2, w3, b3, w4, b4)

    return out[:B]


def init_params(key, input_dims, w_dtype=jnp.bfloat16):
    """PyTorch-Linear-style init (U[-1/sqrt(fan_in), +1/sqrt(fan_in)]).

    Weights stored (in_features, out_features) so the kernel computes x @ W + b.
    The final layer's weight is stored as a (1, 512) row for the VPU reduction.
    Biases stay f32 (bias-add / ReLU are f32 in the kernel).
    """
    layer_dims = [(input_dims, FC1), (FC1, FC2), (FC2, FC1), (FC1, 1)]
    params = []
    for li, (fan_in, fan_out) in enumerate(layer_dims):
        key, kw, kb = jax.random.split(key, 3)
        bound = 1.0 / math.sqrt(fan_in)
        w = jax.random.uniform(kw, (fan_in, fan_out), jnp.float32, -bound, bound)
        b = jax.random.uniform(kb, (1, fan_out), jnp.float32, -bound, bound)
        if li == len(layer_dims) - 1:
            w = w.T                      # (1, FC1) row for the reduce-based head
        params.append((w.astype(w_dtype), b))
    return params


def reference_forward(state, params):
    """Plain-JAX reference with the same precision policy (bf16 matmul in, f32 acc)."""
    (w1, b1), (w2, b2), (w3, b3), (w4, b4) = params
    h = state
    for w, b in ((w1, b1), (w2, b2), (w3, b3)):
        h = jnp.dot(h.astype(jnp.bfloat16), w,
                    preferred_element_type=jnp.float32) + b
        h = jnp.maximum(h, 0.0)
    return jnp.sum(h * w4.astype(jnp.float32), axis=-1, keepdims=True) + b4


if __name__ == "__main__":
    key = jax.random.PRNGKey(0)
    k_params, k_state = jax.random.split(key)

    input_dims = 32
    params = init_params(k_params, input_dims)

    # Small single-tile case.
    batch = 8
    state = jax.random.normal(k_state, (batch, input_dims), jnp.float32)
    value = jax.block_until_ready(critic_forward(state, params))
    ref = reference_forward(state, params)
    assert value.shape == (batch, 1), value.shape
    assert jnp.allclose(value, ref, atol=1e-3, rtol=1e-3), (value, ref)

    # Multi-tile case (exercises the 2-step parallel grid + row padding).
    batch2 = 48
    state2 = jax.random.normal(jax.random.PRNGKey(1), (batch2, input_dims),
                               jnp.float32)
    value2 = jax.block_until_ready(critic_forward(state2, params))
    ref2 = reference_forward(state2, params)
    assert value2.shape == (batch2, 1), value2.shape
    assert jnp.allclose(value2, ref2, atol=1e-3, rtol=1e-3), (value2, ref2)

    print("KERNEL_OK")
</pallas_src>

<mosaic_0001>
module attributes {stable_mosaic.version = 11 : i64} {
  func.func @critic_kernel(%arg0: i32, %arg1: memref<16x128xbf16, #tpu.memory_space<vmem>>, %arg2: memref<128x512xbf16, #tpu.memory_space<vmem>>, %arg3: memref<1x512xf32, #tpu.memory_space<vmem>>, %arg4: memref<512x1024xbf16, #tpu.memory_space<vmem>>, %arg5: memref<1x1024xf32, #tpu.memory_space<vmem>>, %arg6: memref<1024x512xbf16, #tpu.memory_space<vmem>>, %arg7: memref<1x512xf32, #tpu.memory_space<vmem>>, %arg8: memref<1x512xbf16, #tpu.memory_space<vmem>>, %arg9: memref<1x1xf32, #tpu.memory_space<vmem>>, %arg10: memref<16x1xf32, #tpu.memory_space<vmem>>) attributes {dimension_semantics = [#tpu.dimension_semantics<parallel>], iteration_bounds = array<i64: 1>, scalar_prefetch = 0 : i64, scratch_operands = 0 : i64, tpu.core_type = #tpu.core_type<tc>, window_params = [{transform_indices = @transform_0, window_bounds = array<i64: 16, 128>}, {pipeline_mode = #tpu.pipeline_mode<synchronous>, transform_indices = @transform_1, window_bounds = array<i64: 128, 512>}, {pipeline_mode = #tpu.pipeline_mode<synchronous>, transform_indices = @transform_2, window_bounds = array<i64: 1, 512>}, {pipeline_mode = #tpu.pipeline_mode<synchronous>, transform_indices = @transform_3, window_bounds = array<i64: 512, 1024>}, {pipeline_mode = #tpu.pipeline_mode<synchronous>, transform_indices = @transform_4, window_bounds = array<i64: 1, 1024>}, {pipeline_mode = #tpu.pipeline_mode<synchronous>, transform_indices = @transform_5, window_bounds = array<i64: 1024, 512>}, {pipeline_mode = #tpu.pipeline_mode<synchronous>, transform_indices = @transform_6, window_bounds = array<i64: 1, 512>}, {pipeline_mode = #tpu.pipeline_mode<synchronous>, transform_indices = @transform_7, window_bounds = array<i64: 1, 512>}, {pipeline_mode = #tpu.pipeline_mode<synchronous>, transform_indices = @transform_8, window_bounds = array<i64: 1, 1>}, {transform_indices = @transform_9, window_bounds = array<i64: 16, 1>}]} {
    %c0 = arith.constant 0 : index
    %c0_0 = arith.constant 0 : index
    %0 = vector.load %arg1[%c0, %c0_0] : memref<16x128xbf16, #tpu.memory_space<vmem>>, vector<16x128xbf16>
    %c0_1 = arith.constant 0 : index
    %c0_2 = arith.constant 0 : index
    %1 = vector.load %arg2[%c0_1, %c0_2] : memref<128x512xbf16, #tpu.memory_space<vmem>>, vector<128x512xbf16>
    %cst = arith.constant dense<0.000000e+00> : vector<16x512xf32>
    %2 = tpu.matmul %0, %1, %cst {dimension_numbers = #tpu.dot_dimension_numbers<[1], [0], [0], [1], [0, 0, 1, 1], [], []>} : vector<16x128xbf16>, vector<128x512xbf16>, vector<16x512xf32> -> vector<16x512xf32>
    %c0_3 = arith.constant 0 : index
    %c0_4 = arith.constant 0 : index
    %3 = vector.load %arg3[%c0_3, %c0_4] : memref<1x512xf32, #tpu.memory_space<vmem>>, vector<1x512xf32>
    %4 = vector.broadcast %3 : vector<1x512xf32> to vector<16x512xf32>
    %5 = arith.addf %2, %4 : vector<16x512xf32>
    %cst_5 = arith.constant 0.000000e+00 : f32
    %6 = vector.broadcast %cst_5 : f32 to vector<16x512xf32>
    %7 = arith.maximumf %5, %6 : vector<16x512xf32>
    %8 = arith.truncf %7 : vector<16x512xf32> to vector<16x512xbf16>
    %c0_6 = arith.constant 0 : index
    %c0_7 = arith.constant 0 : index
    %9 = vector.load %arg4[%c0_6, %c0_7] : memref<512x1024xbf16, #tpu.memory_space<vmem>>, vector<512x1024xbf16>
    %cst_8 = arith.constant dense<0.000000e+00> : vector<16x1024xf32>
    %10 = tpu.matmul %8, %9, %cst_8 {dimension_numbers = #tpu.dot_dimension_numbers<[1], [0], [0], [1], [0, 0, 1, 1], [], []>} : vector<16x512xbf16>, vector<512x1024xbf16>, vector<16x1024xf32> -> vector<16x1024xf32>
    %c0_9 = arith.constant 0 : index
    %c0_10 = arith.constant 0 : index
    %11 = vector.load %arg5[%c0_9, %c0_10] : memref<1x1024xf32, #tpu.memory_space<vmem>>, vector<1x1024xf32>
    %12 = vector.broadcast %11 : vector<1x1024xf32> to vector<16x1024xf32>
    %13 = arith.addf %10, %12 : vector<16x1024xf32>
    %cst_11 = arith.constant 0.000000e+00 : f32
    %14 = vector.broadcast %cst_11 : f32 to vector<16x1024xf32>
    %15 = arith.maximumf %13, %14 : vector<16x1024xf32>
    %16 = arith.truncf %15 : vector<16x1024xf32> to vector<16x1024xbf16>
    %c0_12 = arith.constant 0 : index
    %c0_13 = arith.constant 0 : index
    %17 = vector.load %arg6[%c0_12, %c0_13] : memref<1024x512xbf16, #tpu.memory_space<vmem>>, vector<1024x512xbf16>
    %cst_14 = arith.constant dense<0.000000e+00> : vector<16x512xf32>
    %18 = tpu.matmul %16, %17, %cst_14 {dimension_numbers = #tpu.dot_dimension_numbers<[1], [0], [0], [1], [0, 0, 1, 1], [], []>} : vector<16x1024xbf16>, vector<1024x512xbf16>, vector<16x512xf32> -> vector<16x512xf32>
    %c0_15 = arith.constant 0 : index
    %c0_16 = arith.constant 0 : index
    %19 = vector.load %arg7[%c0_15, %c0_16] : memref<1x512xf32, #tpu.memory_space<vmem>>, vector<1x512xf32>
    %20 = vector.broadcast %19 : vector<1x512xf32> to vector<16x512xf32>
    %21 = arith.addf %18, %20 : vector<16x512xf32>
    %cst_17 = arith.constant 0.000000e+00 : f32
    %22 = vector.broadcast %cst_17 : f32 to vector<16x512xf32>
    %23 = arith.maximumf %21, %22 : vector<16x512xf32>
    %c0_18 = arith.constant 0 : index
    %c0_19 = arith.constant 0 : index
    %24 = vector.load %arg8[%c0_18, %c0_19] : memref<1x512xbf16, #tpu.memory_space<vmem>>, vector<1x512xbf16>
    %25 = arith.extf %24 : vector<1x512xbf16> to vector<1x512xf32>
    %26 = vector.broadcast %25 : vector<1x512xf32> to vector<16x512xf32>
    %27 = arith.mulf %23, %26 : vector<16x512xf32>
    %cst_20 = arith.constant dense<0.000000e+00> : vector<16xf32>
    %28 = vector.multi_reduction <add>, %27, %cst_20 [1] : vector<16x512xf32> to vector<16xf32>
    %29 = vector.shape_cast %28 : vector<16xf32> to vector<16x1xf32>
    %c0_21 = arith.constant 0 : index
    %c0_22 = arith.constant 0 : index
    %30 = vector.load %arg9[%c0_21, %c0_22] : memref<1x1xf32, #tpu.memory_space<vmem>>, vector<1x1xf32>
    %31 = vector.broadcast %30 : vector<1x1xf32> to vector<16x1xf32>
    %32 = arith.addf %29, %31 : vector<16x1xf32>
    %c0_23 = arith.constant 0 : index
    %c0_24 = arith.constant 0 : index
    %33 = vector.load %arg10[%c0_23, %c0_24] : memref<16x1xf32, #tpu.memory_space<vmem>>, vector<16x1xf32>
    tpu.vector_store %arg10[%c0_23, %c0_24], %32 {strides = array<i32>} : memref<16x1xf32, #tpu.memory_space<vmem>>, vector<16x1xf32>,
    return
  }
  func.func @transform_0(%arg0: i32) -> (i32, i32) {
    %c0_i32 = arith.constant 0 : i32
    %c0_i32_0 = arith.constant 0 : i32
    return %arg0, %c0_i32 : i32, i32
  }
  func.func @transform_1(%arg0: i32) -> (i32, i32) {
    %c0_i32 = arith.constant 0 : i32
    %c0_i32_0 = arith.constant 0 : i32
    %c0_i32_1 = arith.constant 0 : i32
    return %c0_i32, %c0_i32_0 : i32, i32
  }
  func.func @transform_2(%arg0: i32) -> (i32, i32) {
    %c0_i32 = arith.constant 0 : i32
    %c0_i32_0 = arith.constant 0 : i32
    %c0_i32_1 = arith.constant 0 : i32
    return %c0_i32, %c0_i32_0 : i32, i32
  }
  func.func @transform_3(%arg0: i32) -> (i32, i32) {
    %c0_i32 = arith.constant 0 : i32
    %c0_i32_0 = arith.constant 0 : i32
    %c0_i32_1 = arith.constant 0 : i32
    return %c0_i32, %c0_i32_0 : i32, i32
  }
  func.func @transform_4(%arg0: i32) -> (i32, i32) {
    %c0_i32 = arith.constant 0 : i32
    %c0_i32_0 = arith.constant 0 : i32
    %c0_i32_1 = arith.constant 0 : i32
    return %c0_i32, %c0_i32_0 : i32, i32
  }
  func.func @transform_5(%arg0: i32) -> (i32, i32) {
    %c0_i32 = arith.constant 0 : i32
    %c0_i32_0 = arith.constant 0 : i32
    %c0_i32_1 = arith.constant 0 : i32
    return %c0_i32, %c0_i32_0 : i32, i32
  }
  func.func @transform_6(%arg0: i32) -> (i32, i32) {
    %c0_i32 = arith.constant 0 : i32
    %c0_i32_0 = arith.constant 0 : i32
    %c0_i32_1 = arith.constant 0 : i32
    return %c0_i32, %c0_i32_0 : i32, i32
  }
  func.func @transform_7(%arg0: i32) -> (i32, i32) {
    %c0_i32 = arith.constant 0 : i32
    %c0_i32_0 = arith.constant 0 : i32
    %c0_i32_1 = arith.constant 0 : i32
    return %c0_i32, %c0_i32_0 : i32, i32
  }
  func.func @transform_8(%arg0: i32) -> (i32, i32) {
    %c0_i32 = arith.constant 0 : i32
    %c0_i32_0 = arith.constant 0 : i32
    %c0_i32_1 = arith.constant 0 : i32
    return %c0_i32, %c0_i32_0 : i32, i32
  }
  func.func @transform_9(%arg0: i32) -> (i32, i32) {
    %c0_i32 = arith.constant 0 : i32
    %c0_i32_0 = arith.constant 0 : i32
    return %arg0, %c0_i32 : i32, i32
  }
}

</mosaic_0001>

<bundles_post_ra>
// kernel: tpu_custom_call.1
= control target key start
LH: loop header
LB: loop body
LE: loop exit
PB: predicated region body
PF: predicated region fallthrough
CT: control target
= control target key end

     0   :  { %s5712_s0 = inlined_call_operand.hbm [shape: bf16[16,128], index: 0, kind: input, shape index: {}]   ;;  %s5713_s1 = inlined_call_operand.hbm [shape: bf16[128,512], index: 1, kind: input, shape index: {}]   ;;  %s5714_s2 = inlined_call_operand.vmem [shape: f32[1,512], index: 2, kind: input, shape index: {}]   ;;  %s5715_s3 = inlined_call_operand.hbm [shape: bf16[512,1024], index: 3, kind: input, shape index: {}]   ;;  %s5716_s4 = inlined_call_operand.vmem [shape: f32[1,1024], index: 4, kind: input, shape index: {}]   ;;  %s5717_s5 = inlined_call_operand.hbm [shape: bf16[1024,512], index: 5, kind: input, shape index: {}]   ;;  %s5718_s6 = inlined_call_operand.vmem [shape: f32[1,512], index: 6, kind: input, shape index: {}]   ;;  %s5719_s7 = inlined_call_operand.vmem [shape: bf16[1,512], index: 7, kind: input, shape index: {}]   ;;  %s5720_s8 = inlined_call_operand.<no memory space> [shape: f32[1,1], index: 8, kind: input, shape index: {}]   ;;  %s5721_s9 = inlined_call_operand.vmem [shape: f32[16,1], index: 9, kind: output, shape index: {}]  }
   0x1   :  { %v14_v0 = vstv %s5720_s8 }
   0x2   :  { %15 = vst [vmem:[#allocation2] sm:$0x1] %v14_v0 }
   0x3   :  { %16 = vsyncpa [#allocation4], 0 }
   0x4   :  { %17 = vsyncpa [#allocation6], 0 }
   0x5   :  { %18 = vsyncpa [#allocation9], 0  ;;  %s5490_s11 = smov [#allocation5]   ;;  %s5396_s15 = scalar_lea.hbm %s5713_s1, 4096 }
   0x6   :  { %s36_s12 = sshll.u32 %s5490_s11, 4  ;;  %p5397_p0 = scmp.ne.s32.totalorder %s5713_s1, %s5396_s15  ;;  %s37_s12 = int_to_ptr.vmem [resolvable:$true] %s36_s12 }
   0x7   :  { %p5400_p1 = scmp.lt.u32.totalorder %s5396_s15, %s5713_s1 }
   0x9   :  { %p5402_p2 = pnand %p5400_p1, %p5397_p0 }
   0xb   :  { %5405 = shalt.err (!%p5402_p2)
}
   0xc   :  { %s5406_s8 = scalar_lea.vmem %s37_s12, 4096  ;;  %p5411_p4 = scmp.lt.s32.totalorder %s37_s12, %s37_s12 }
   0xd   :  { %p5407_p3 = scmp.ne.s32.totalorder %s37_s12, %s5406_s8  ;;  %p5412_p5 = scmp.lt.s32.totalorder %s5406_s8, %s5406_s8 }
   0xf   :  { %p5413_p6 = por %p5412_p5, %p5411_p4 }
  0x11   :  { %p5414_p7 = pnand %p5413_p6, %p5407_p3 }
  0x13   :  { %5417 = shalt.err (!%p5414_p7)
}
  0x14   :  { %s5491_s20 = smov 256   ;;  %s5492_s21 = smov 16  }
  0x15   :  { %42 = dma.hbm_to_vmem [thread:$0]  %s5713_s1, 4096, %s37_s12, [#allocation6], %s5491_s20, %s5491_s20, %s5492_s21  }
  0x16   :  { %s5493_s24 = smov [#allocation3]   ;;  %s5418_s28 = scalar_lea.hbm %s5712_s0, 128 }
  0x17   :  { %s24_s25 = sshll.u32 %s5493_s24, 4  ;;  %p5419_p8 = scmp.ne.s32.totalorder %s5712_s0, %s5418_s28  ;;  %s25_s25 = int_to_ptr.vmem [resolvable:$true] %s24_s25 }
  0x18   :  { %p5422_p9 = scmp.lt.u32.totalorder %s5418_s28, %s5712_s0 }
  0x1a   :  { %p5424_p10 = pnand %p5422_p9, %p5419_p8 }
  0x1c   :  { %5427 = shalt.err (!%p5424_p10)
}
  0x1d   :  { %s5428_s13 = scalar_lea.vmem %s25_s25, 128  ;;  %p5433_p12 = scmp.lt.s32.totalorder %s25_s25, %s25_s25 }
  0x1e   :  { %p5429_p11 = scmp.ne.s32.totalorder %s25_s25, %s5428_s13  ;;  %p5434_p13 = scmp.lt.s32.totalorder %s5428_s13, %s5428_s13 }
  0x20   :  { %p5435_p0 = por %p5434_p13, %p5433_p12 }
  0x22   :  { %p5436_p1 = pnand %p5435_p0, %p5429_p11 }
  0x24   :  { %5439 = shalt.err (!%p5436_p1)
}
  0x25   :  { %s5494_s1 = smov 64   ;;  %s5495_s12 = smov 4  }
  0x26   :  { %30 = dma.hbm_to_vmem [thread:$0]  %s5712_s0, 128, %s25_s25, [#allocation4], %s5494_s1, %s5494_s1, %s5495_s12  }
  0x27   :  { %s5496_s16 = smov [#allocation7]   ;;  %s5440_s8 = scalar_lea.hbm %s5715_s3, 32768 }
  0x28   :  { %s50_s17 = sshll.u32 %s5496_s16, 4  ;;  %p5441_p2 = scmp.ne.s32.totalorder %s5715_s3, %s5440_s8  ;;  %s51_s17 = int_to_ptr.vmem [resolvable:$true] %s50_s17 }
  0x29   :  { %p5444_p3 = scmp.lt.u32.totalorder %s5440_s8, %s5715_s3 }
  0x2b   :  { %p5446_p4 = pnand %p5444_p3, %p5441_p2 }
  0x2d   :  { %5449 = shalt.err (!%p5446_p4)
}
  0x2e   :  { %s5450_s27 = scalar_lea.vmem %s51_s17, 32768  ;;  %p5455_p6 = scmp.lt.s32.totalorder %s51_s17, %s51_s17 }
  0x2f   :  { %p5451_p5 = scmp.ne.s32.totalorder %s51_s17, %s5450_s27  ;;  %p5456_p7 = scmp.lt.s32.totalorder %s5450_s27, %s5450_s27 }
  0x31   :  { %p5457_p8 = por %p5456_p7, %p5455_p6 }
  0x33   :  { %p5458_p9 = pnand %p5457_p8, %p5451_p5 }
  0x35   :  { %5461 = shalt.err (!%p5458_p9)
}
  0x36   :  { %s5497_s0 = smov 512   ;;  %s5498_s25 = smov 32  }
  0x37   :  { %56 = dma.hbm_to_vmem [thread:$0]  %s5715_s3, 32768, %s51_s17, [#allocation6], %s5497_s0, %s5497_s0, %s5498_s25  }
  0x38   :  { %s5499_s30 = smov [#allocation8]   ;;  %s5462_s1 = scalar_lea.hbm %s5717_s5, 32768 }
  0x39   :  { %s64_s10 = sshll.u32 %s5499_s30, 4  ;;  %p5463_p10 = scmp.ne.s32.totalorder %s5717_s5, %s5462_s1  ;;  %s65_s10 = int_to_ptr.vmem [resolvable:$true] %s64_s10 }
  0x3a   :  { %p5466_p11 = scmp.lt.u32.totalorder %s5462_s1, %s5717_s5 }
  0x3c   :  { %p5468_p12 = pnand %p5466_p11, %p5463_p10 }
  0x3e   :  { %5471 = shalt.err (!%p5468_p12)
}
  0x3f   :  { %s5472_s18 = scalar_lea.vmem %s65_s10, 32768  ;;  %p5477_p0 = scmp.lt.s32.totalorder %s65_s10, %s65_s10 }
  0x40   :  { %p5473_p13 = scmp.ne.s32.totalorder %s65_s10, %s5472_s18  ;;  %p5478_p1 = scmp.lt.s32.totalorder %s5472_s18, %s5472_s18 }
  0x42   :  { %p5479_p2 = por %p5478_p1, %p5477_p0 }
  0x44   :  { %p5480_p3 = pnand %p5479_p2, %p5473_p13 }
  0x46   :  { %5483 = shalt.err (!%p5480_p3)
}
  0x47   :  { %70 = dma.hbm_to_vmem [thread:$0]  %s5717_s5, 32768, %s65_s10, [#allocation9], %s5491_s20, %s5491_s20, %s5492_s21  }
  0x48   :  { %5484 = dma.done.wait [#allocation4], 128  }
  0x49   :  { %5485 = vsyncadd [#allocation4], 4294967168 }
  0x4a   :  { %5486 = dma.done.wait [#allocation6], 36864  }
  0x4b   :  { %5487 = vsyncadd [#allocation6], 4294930432 }
  0x4c   :  { %5488 = dma.done.wait [#allocation9], 32768  }
  0x4d   :  { %5489 = vsyncadd [#allocation9], 4294934528  ;;  %v5500_v1 = vmov 0   ;;  %v4963_v2 = vld [vmem:[#allocation5 + $0x4] ss:$16 sps:$4 sm:$0xff]   ;;  %v4987_v34 = vld [vmem:[#allocation3] sm:$0xff]  }
  0x4e   :  { %344 = vmatprep.mubr.bf16.mxu0 %v5500_v1  ;;  %387 = vmatprep.mubr.bf16.mxu1 %v5500_v1  ;;  %v4965_v3 = vld [vmem:[#allocation5] ss:$16 sps:$4 sm:$0xff]   ;;  %v4966_v4 = vld [vmem:[#allocation5 + $0x24] ss:$16 sps:$4 sm:$0xff]   ;;  %v4988_v11 = vld [vmem:[#allocation5 + $0xc] ss:$16 sps:$4 sm:$0xff]  }
  0x4f   :  { %312 = vmatprep.subr.bf16.mxu0 %v4963_v2  ;;  %v4968_v5 = vld [vmem:[#allocation5 + $0x20] ss:$16 sps:$4 sm:$0xff]   ;;  %v4969_v6 = vld [vmem:[#allocation5 + $0x44] ss:$16 sps:$4 sm:$0xff]   ;;  %v4990_v12 = vld [vmem:[#allocation5 + $0x8] ss:$16 sps:$4 sm:$0xff]   ;;  %355 = vmatprep.subr.bf16.mxu1 %v4988_v11 }
  0x50   :  { %313 = vmatpush1.bf16.msra.mxu0 %v4965_v3  ;;  %v4971_v7 = vld [vmem:[#allocation5 + $0x40] ss:$16 sps:$4 sm:$0xff]   ;;  %v4972_v8 = vld [vmem:[#allocation5 + $0x64] ss:$16 sps:$4 sm:$0xff]   ;;  %v4991_v13 = vld [vmem:[#allocation5 + $0x2c] ss:$16 sps:$4 sm:$0xff]   ;;  %356 = vmatpush1.bf16.msra.mxu1 %v4990_v12 }
  0x51   :  { %314 = vmatprep.subr.bf16.mxu0 %v4966_v4  ;;  %v4974_v9 = vld [vmem:[#allocation5 + $0x60] ss:$16 sps:$4 sm:$0xff]   ;;  %v4975_v10 = vld [vmem:[#allocation5 + $0x84] ss:$16 sps:$4 sm:$0xff]   ;;  %v4993_v15 = vld [vmem:[#allocation5 + $0x28] ss:$16 sps:$4 sm:$0xff]   ;;  %357 = vmatprep.subr.bf16.mxu1 %v4991_v13 }
  0x52   :  { %v4977_v14 = vld [vmem:[#allocation5 + $0x80] ss:$16 sps:$4 sm:$0xff]   ;;  %v4978_v16 = vld [vmem:[#allocation5 + $0xa4] ss:$16 sps:$4 sm:$0xff]   ;;  %v4994_v17 = vld [vmem:[#allocation5 + $0x4c] ss:$16 sps:$4 sm:$0xff]  }
  0x53   :  { %v4980_v18 = vld [vmem:[#allocation5 + $0xa0] ss:$16 sps:$4 sm:$0xff]   ;;  %v4996_v19 = vld [vmem:[#allocation5 + $0x48] ss:$16 sps:$4 sm:$0xff]   ;;  %v4981_v20 = vld [vmem:[#allocation5 + $0xc4] ss:$16 sps:$4 sm:$0xff]  }
  0x54   :  { %315 = vmatpush1.bf16.msra.mxu0 %v4968_v5  ;;  %358 = vmatpush1.bf16.msra.mxu1 %v4993_v15  ;;  %v4997_v21 = vld [vmem:[#allocation5 + $0x6c] ss:$16 sps:$4 sm:$0xff]   ;;  %v4983_v22 = vld [vmem:[#allocation5 + $0xc0] ss:$16 sps:$4 sm:$0xff]   ;;  %v4999_v23 = vld [vmem:[#allocation5 + $0x68] ss:$16 sps:$4 sm:$0xff]  }
  0x55   :  { %316 = vmatprep.subr.bf16.mxu0 %v4969_v6  ;;  %359 = vmatprep.subr.bf16.mxu1 %v4994_v17  ;;  %v4984_v24 = vld [vmem:[#allocation5 + $0xe4] ss:$16 sps:$4 sm:$0xff]   ;;  %v5000_v25 = vld [vmem:[#allocation5 + $0x8c] ss:$16 sps:$4 sm:$0xff]   ;;  %v4986_v28 = vld [vmem:[#allocation5 + $0xe0] ss:$16 sps:$4 sm:$0xff]  }
  0x56   :  { %v410_v26 = vld [vmem:[#allocation7] sm:$0xff]  ;;  %v5002_v29 = vld [vmem:[#allocation5 + $0x88] ss:$16 sps:$4 sm:$0xff]   ;;  %v5003_v30 = vld [vmem:[#allocation5 + $0xac] ss:$16 sps:$4 sm:$0xff]   ;;  %vm4332_vm0 = vcmask 7168  }
  0x57   :  { %v414_v27 = vld [vmem:[#allocation7 + $0x20] sm:$0xff]  ;;  %v5005_v35 = vld [vmem:[#allocation5 + $0xa8] ss:$16 sps:$4 sm:$0xff]   ;;  %v5006_v37 = vld [vmem:[#allocation5 + $0xcc] ss:$16 sps:$4 sm:$0xff]  }
  0x58   :  { %317 = vmatpush1.bf16.msra.mxu0 %v4971_v7  ;;  %360 = vmatpush1.bf16.msra.mxu1 %v4996_v19  ;;  %v4376_v31 = vcombine.high %v410_v26, %v414_v27  ;;  %v418_v32 = vld [vmem:[#allocation7 + $0x40] sm:$0xff]  ;;  %v4375_v36 = vcombine.low %v410_v26, %v414_v27  ;;  %v5008_v41 = vld [vmem:[#allocation5 + $0xc8] ss:$16 sps:$4 sm:$0xff]   ;;  %v5009_v43 = vld [vmem:[#allocation5 + $0xec] ss:$16 sps:$4 sm:$0xff]  }
  0x59   :  { %318 = vmatprep.subr.bf16.mxu0 %v4972_v8  ;;  %361 = vmatprep.subr.bf16.mxu1 %v4997_v21  ;;  %v422_v33 = vld [vmem:[#allocation7 + $0x60] sm:$0xff]  ;;  %v411_v44 = vld [vmem:[#allocation7 + $0x8] sm:$0xff] }
  0x5a   :  { %v4384_v38 = vcombine.high %v418_v32, %v422_v33  ;;  %v426_v39 = vld [vmem:[#allocation7 + $0x80] sm:$0xff]  ;;  %v4383_v42 = vcombine.low %v418_v32, %v422_v33  ;;  %v415_v46 = vld [vmem:[#allocation7 + $0x28] sm:$0xff] }
  0x5b   :  { %v430_v40 = vld [vmem:[#allocation7 + $0xa0] sm:$0xff]  ;;  %v5011_v49 = vld [vmem:[#allocation5 + $0xe8] ss:$16 sps:$4 sm:$0xff]   ;;  %v4378_v51 = vcombine.high %v411_v44, %v415_v46  ;;  %v4377_v57 = vcombine.low %v411_v44, %v415_v46 }
  0x5c   :  { %319 = vmatpush1.bf16.msra.mxu0 %v4974_v9  ;;  %362 = vmatpush1.bf16.msra.mxu1 %v4999_v23  ;;  %v4392_v45 = vcombine.high %v426_v39, %v430_v40  ;;  %v434_v47 = vld [vmem:[#allocation7 + $0xc0] sm:$0xff]  ;;  %v4391_v50 = vcombine.low %v426_v39, %v430_v40  ;;  %v419_v52 = vld [vmem:[#allocation7 + $0x48] sm:$0xff] }
  0x5d   :  { %320 = vmatprep.subr.bf16.mxu0 %v4975_v10  ;;  %363 = vmatprep.subr.bf16.mxu1 %v5000_v25  ;;  %v438_v48 = vld [vmem:[#allocation7 + $0xe0] sm:$0xff]  ;;  %v423_v53 = vld [vmem:[#allocation7 + $0x68] sm:$0xff] }
  0x5e   :  { %v4400_v54 = vcombine.high %v434_v47, %v438_v48  ;;  %v442_v55 = vld [vmem:[#allocation7 + $0x100] sm:$0xff]  ;;  %v427_v58 = vld [vmem:[#allocation7 + $0x88] sm:$0xff]  ;;  %v4399_v60 = vcombine.low %v434_v47, %v438_v48  ;;  %v4386_v63 = vcombine.high %v419_v52, %v423_v53  ;;  %v4385_v1 = vcombine.low %v419_v52, %v423_v53 }
  0x5f   :  { %v446_v56 = vld [vmem:[#allocation7 + $0x120] sm:$0xff]  ;;  %v431_v59 = vld [vmem:[#allocation7 + $0xa8] sm:$0xff] }
  0x60   :  { %321 = vmatpush1.bf16.msra.mxu0 %v4977_v14  ;;  %364 = vmatpush1.bf16.msra.mxu1 %v5002_v29  ;;  %v450_v61 = vld [vmem:[#allocation7 + $0x140] sm:$0xff]  ;;  %v4408_v0 = vcombine.high %v442_v55, %v446_v56  ;;  %v435_v2 = vld [vmem:[#allocation7 + $0xc8] sm:$0xff]  ;;  %v4407_v4 = vcombine.low %v442_v55, %v446_v56  ;;  %v4394_v7 = vcombine.high %v427_v58, %v431_v59 }
  0x61   :  { %322 = vmatprep.subr.bf16.mxu0 %v4978_v16  ;;  %365 = vmatprep.subr.bf16.mxu1 %v5003_v30  ;;  %v454_v62 = vld [vmem:[#allocation7 + $0x160] sm:$0xff]  ;;  %v439_v3 = vld [vmem:[#allocation7 + $0xe8] sm:$0xff]  ;;  %v4393_v9 = vcombine.low %v427_v58, %v431_v59 }
  0x62   :  { %v458_v5 = vld [vmem:[#allocation7 + $0x180] sm:$0xff]  ;;  %v4416_v8 = vcombine.high %v450_v61, %v454_v62  ;;  %v443_v10 = vld [vmem:[#allocation7 + $0x108] sm:$0xff]  ;;  %v4415_v12 = vcombine.low %v450_v61, %v454_v62  ;;  %v4402_v15 = vcombine.high %v435_v2, %v439_v3  ;;  %v4401_v17 = vcombine.low %v435_v2, %v439_v3 }
  0x63   :  { %v462_v6 = vld [vmem:[#allocation7 + $0x1a0] sm:$0xff]  ;;  %v447_v11 = vld [vmem:[#allocation7 + $0x128] sm:$0xff] }
  0x64   :  { %323 = vmatpush1.bf16.msra.mxu0 %v4980_v18  ;;  %366 = vmatpush1.bf16.msra.mxu1 %v5005_v35  ;;  %v466_v13 = vld [vmem:[#allocation7 + $0x1c0] sm:$0xff]  ;;  %v4424_v16 = vcombine.high %v458_v5, %v462_v6  ;;  %v451_v18 = vld [vmem:[#allocation7 + $0x148] sm:$0xff]  ;;  %v4410_v23 = vcombine.high %v443_v10, %v447_v11  ;;  %v4409_v25 = vcombine.low %v443_v10, %v447_v11 }
  0x65   :  { %324 = vmatprep.subr.bf16.mxu0 %v4981_v20  ;;  %367 = vmatprep.subr.bf16.mxu1 %v5006_v37  ;;  %v470_v14 = vld [vmem:[#allocation7 + $0x1e0] sm:$0xff]  ;;  %v455_v19 = vld [vmem:[#allocation7 + $0x168] sm:$0xff]  ;;  %v4423_v20 = vcombine.low %v458_v5, %v462_v6 }
  0x66   :  { %v474_v21 = vld [vmem:[#allocation7 + $0x200] sm:$0xff]  ;;  %v459_v26 = vld [vmem:[#allocation7 + $0x188] sm:$0xff]  ;;  %v4417_v33 = vcombine.low %v451_v18, %v455_v19 }
  0x67   :  { %v463_v27 = vld [vmem:[#allocation7 + $0x1a8] sm:$0xff]  ;;  %v482_v29 = vld [vmem:[#allocation7 + $0x240] sm:$0xff] }
  0x68   :  { %325 = vmatpush1.bf16.msra.mxu0 %v4983_v22  ;;  %368 = vmatpush1.bf16.msra.mxu1 %v5008_v41  ;;  %v478_v22 = vld [vmem:[#allocation7 + $0x220] sm:$0xff]  ;;  %v471_v35 = vld [vmem:[#allocation7 + $0x1e8] sm:$0xff]  ;;  %v4426_v39 = vcombine.high %v459_v26, %v463_v27  ;;  %v4425_v41 = vcombine.low %v459_v26, %v463_v27 }
  0x69   :  { %326 = vmatprep.subr.bf16.mxu0 %v4984_v24  ;;  %369 = vmatprep.subr.bf16.mxu1 %v5009_v43  ;;  %v4432_v24 = vcombine.high %v466_v13, %v470_v14  ;;  %v486_v30 = vld [vmem:[#allocation7 + $0x260] sm:$0xff]  ;;  %v4440_v32 = vcombine.high %v474_v21, %v478_v22  ;;  %v479_v43 = vld [vmem:[#allocation7 + $0x228] sm:$0xff] }
  0x6a   :  { %v490_v37 = vld [vmem:[#allocation7 + $0x280] sm:$0xff]  ;;  %v4448_v40 = vcombine.high %v482_v29, %v486_v30  ;;  %v4447_v44 = vcombine.low %v482_v29, %v486_v30  ;;  %v491_v58 = vld [vmem:[#allocation7 + $0x288] sm:$0xff] }
  0x6b   :  { %v502_v46 = vld [vmem:[#allocation7 + $0x2e0] sm:$0xff]  ;;  %v495_v59 = vld [vmem:[#allocation7 + $0x2a8] sm:$0xff] }
  0x6c   :  { %327 = vmatpush1.bf16.msra.mxu0 %v4986_v28  ;;  %370 = vmatpush1.bf16.msra.mxu1 %v5011_v49  ;;  %v4431_v28 = vcombine.low %v466_v13, %v470_v14  ;;  %v506_v53 = vld [vmem:[#allocation7 + $0x300] sm:$0xff]  ;;  %v499_v2 = vld [vmem:[#allocation7 + $0x2c8] sm:$0xff]  ;;  %v4458_v5 = vcombine.high %v491_v58, %v495_v59 }
  0x6d   :  { %1988 = vmatprep.subr.bf16.mxu0 %v4376_v31  ;;  %2074 = vmatprep.subr.bf16.mxu1 %v4378_v51  ;;  %v4418_v31 = vcombine.high %v451_v18, %v455_v19  ;;  %v487_v51 = vld [vmem:[#allocation7 + $0x268] sm:$0xff]  ;;  %v514_v61 = vld [vmem:[#allocation7 + $0x340] sm:$0xff] }
  0x6e   :  { %v518_v62 = vld [vmem:[#allocation7 + $0x360] sm:$0xff]  ;;  %v503_v3 = vld [vmem:[#allocation7 + $0x2e8] sm:$0xff] }
  0x6f   :  { %345 = vmatmul.mubr.bf16.vlgmr.msra.gmra.mrb[0].mxu0 %v4987_v34  ;;  %388 = vmatmul.mubr.bf16.vlgmr.msra.gmra.mrb[0].mxu1 %v4987_v34  ;;  %v467_v34 = vld [vmem:[#allocation7 + $0x1c8] sm:$0xff]  ;;  %v4480_v6 = vcombine.high %v514_v61, %v518_v62  ;;  %v4479_v10 = vcombine.low %v514_v61, %v518_v62  ;;  %v4466_v11 = vcombine.high %v499_v2, %v503_v3  ;;  %v522_v19 = vld [vmem:[#allocation7 + $0x380] sm:$0xff] }
  0x70   :  { %1989 = vmatpush1.bf16.msra.mxu0 %v4375_v36  ;;  %2075 = vmatpush1.bf16.msra.mxu1 %v4377_v57  ;;  %v4439_v36 = vcombine.low %v474_v21, %v478_v22  ;;  %v4434_v47 = vcombine.high %v467_v34, %v471_v35  ;;  %v4433_v49 = vcombine.low %v467_v34, %v471_v35  ;;  %v515_v13 = vld [vmem:[#allocation7 + $0x348] sm:$0xff]  ;;  %v530_v27 = vld [vmem:[#allocation7 + $0x3c0] sm:$0xff] }
  0x71   :  { %1990 = vmatprep.subr.bf16.mxu0 %v4384_v38  ;;  %2076 = vmatprep.subr.bf16.mxu1 %v4386_v63  ;;  %v494_v38 = vld [vmem:[#allocation7 + $0x2a0] sm:$0xff]  ;;  %v519_v14 = vld [vmem:[#allocation7 + $0x368] sm:$0xff] }
  0x72   :  { %v4456_v48 = vcombine.high %v490_v37, %v494_v38  ;;  %v4455_v52 = vcombine.low %v490_v37, %v494_v38  ;;  %v4481_v18 = vcombine.low %v515_v13, %v519_v14  ;;  %v523_v21 = vld [vmem:[#allocation7 + $0x388] sm:$0xff]  ;;  %v538_v35 = vld [vmem:[#allocation7 + $0x400] sm:$0xff] }
  0x73   :  { %v531_v29 = vld [vmem:[#allocation7 + $0x3c8] sm:$0xff] }
  0x74   :  { %1991 = vmatpush1.bf16.msra.mxu0 %v4383_v42  ;;  %2077 = vmatpush1.bf16.msra.mxu1 %v4385_v1  ;;  %v475_v42 = vld [vmem:[#allocation7 + $0x208] sm:$0xff] }
  0x75   :  { %1992 = vmatprep.subr.bf16.mxu0 %v4392_v45  ;;  %2078 = vmatprep.subr.bf16.mxu1 %v4394_v7  ;;  %v498_v45 = vld [vmem:[#allocation7 + $0x2c0] sm:$0xff]  ;;  %v4442_v55 = vcombine.high %v475_v42, %v479_v43  ;;  %v4441_v57 = vcombine.low %v475_v42, %v479_v43  ;;  %v4457_v7 = vcombine.low %v491_v58, %v495_v59  ;;  %v539_v37 = vld [vmem:[#allocation7 + $0x408] sm:$0xff]  ;;  %v126_v43 = vlaneseq }
  0x76   :  { %v4464_v56 = vcombine.high %v498_v45, %v502_v46 }
  0x78   :  { %1993 = vmatpush1.bf16.msra.mxu0 %v4391_v50  ;;  %2079 = vmatpush1.bf16.msra.mxu1 %v4393_v9  ;;  %v483_v50 = vld [vmem:[#allocation7 + $0x248] sm:$0xff] }
  0x79   :  { %1994 = vmatprep.subr.bf16.mxu0 %v4400_v54  ;;  %2080 = vmatprep.subr.bf16.mxu1 %v4402_v15  ;;  %v510_v54 = vld [vmem:[#allocation7 + $0x320] sm:$0xff]  ;;  %v4450_v63 = vcombine.high %v483_v50, %v487_v51  ;;  %v4449_v1 = vcombine.low %v483_v50, %v487_v51  ;;  %v511_v9 = vld [vmem:[#allocation7 + $0x328] sm:$0xff] }
  0x7c   :  { %1995 = vmatpush1.bf16.msra.mxu0 %v4399_v60  ;;  %2081 = vmatpush1.bf16.msra.mxu1 %v4401_v17  ;;  %v4463_v60 = vcombine.low %v498_v45, %v502_v46  ;;  %v4482_v17 = vcombine.high %v515_v13, %v519_v14  ;;  %v124_v46 = vld [vmem:[%s5714_s2] sm:$0xf] }
  0x7d   :  { %1996 = vmatprep.subr.bf16.mxu0 %v4408_v0  ;;  %2082 = vmatprep.subr.bf16.mxu1 %v4410_v23  ;;  %v4472_v0 = vcombine.high %v506_v53, %v510_v54  ;;  %v527_v23 = vld [vmem:[#allocation7 + $0x3a8] sm:$0xff] }
  0x7e   :  { %v4490_v26 = vcombine.high %v523_v21, %v527_v23 }
  0x80   :  { %1997 = vmatpush1.bf16.msra.mxu0 %v4407_v4  ;;  %2083 = vmatpush1.bf16.msra.mxu1 %v4409_v25  ;;  %v4471_v4 = vcombine.low %v506_v53, %v510_v54  ;;  %v4489_v25 = vcombine.low %v523_v21, %v527_v23  ;;  %v563_v23 = vld [vmem:[#allocation7 + $0x4c8] sm:$0xff] }
  0x81   :  { %1998 = vmatprep.subr.bf16.mxu0 %v4416_v8  ;;  %2084 = vmatprep.subr.bf16.mxu1 %v4418_v31  ;;  %v507_v8 = vld [vmem:[#allocation7 + $0x308] sm:$0xff] }
  0x82   :  { %v4474_v15 = vcombine.high %v507_v8, %v511_v9  ;;  %v535_v31 = vld [vmem:[#allocation7 + $0x3e8] sm:$0xff] }
  0x83   :  { %v4498_v34 = vcombine.high %v531_v29, %v535_v31 }
  0x84   :  { %1999 = vmatpush1.bf16.msra.mxu0 %v4415_v12  ;;  %2085 = vmatpush1.bf16.msra.mxu1 %v4417_v33  ;;  %v4465_v12 = vcombine.low %v499_v2, %v503_v3  ;;  %v4497_v33 = vcombine.low %v531_v29, %v535_v31  ;;  %v551_v2 = vld [vmem:[#allocation7 + $0x468] sm:$0xff] }
  0x85   :  { %2000 = vmatprep.subr.bf16.mxu0 %v4424_v16  ;;  %2086 = vmatprep.subr.bf16.mxu1 %v4426_v39  ;;  %v4473_v16 = vcombine.low %v507_v8, %v511_v9  ;;  %v543_v39 = vld [vmem:[#allocation7 + $0x428] sm:$0xff]  ;;  %v554_v8 = vld [vmem:[#allocation7 + $0x480] sm:$0xff] }
  0x86   :  { %v4506_v42 = vcombine.high %v539_v37, %v543_v39 }
  0x88   :  { %2001 = vmatpush1.bf16.msra.mxu0 %v4423_v20  ;;  %2087 = vmatpush1.bf16.msra.mxu1 %v4425_v41  ;;  %v526_v20 = vld [vmem:[#allocation7 + $0x3a0] sm:$0xff]  ;;  %v4505_v41 = vcombine.low %v539_v37, %v543_v39  ;;  %v571_v39 = vld [vmem:[#allocation7 + $0x508] sm:$0xff] }
  0x89   :  { %2002 = vmatprep.subr.bf16.mxu0 %v4432_v24  ;;  %2088 = vmatprep.subr.bf16.mxu1 %v4434_v47  ;;  %v4488_v22 = vcombine.high %v522_v19, %v526_v20  ;;  %v4487_v24 = vcombine.low %v522_v19, %v526_v20  ;;  %v562_v19 = vld [vmem:[#allocation7 + $0x4c0] sm:$0xff] }
  0x8c   :  { %2003 = vmatpush1.bf16.msra.mxu0 %v4431_v28  ;;  %2089 = vmatpush1.bf16.msra.mxu1 %v4433_v49  ;;  %v534_v28 = vld [vmem:[#allocation7 + $0x3e0] sm:$0xff] }
  0x8d   :  { %2004 = vmatprep.subr.bf16.mxu0 %v4440_v32  ;;  %2090 = vmatprep.subr.bf16.mxu1 %v4442_v55  ;;  %v4496_v30 = vcombine.high %v530_v27, %v534_v28  ;;  %v4495_v32 = vcombine.low %v530_v27, %v534_v28 }
  0x90   :  { %2005 = vmatpush1.bf16.msra.mxu0 %v4439_v36  ;;  %2091 = vmatpush1.bf16.msra.mxu1 %v4441_v57  ;;  %v542_v36 = vld [vmem:[#allocation7 + $0x420] sm:$0xff] }
  0x91   :  { %2006 = vmatprep.subr.bf16.mxu0 %v4448_v40  ;;  %2092 = vmatprep.subr.bf16.mxu1 %v4450_v63  ;;  %v4504_v38 = vcombine.high %v538_v35, %v542_v36  ;;  %v4503_v40 = vcombine.low %v538_v35, %v542_v36  ;;  %v570_v36 = vld [vmem:[#allocation7 + $0x500] sm:$0xff] }
  0x94   :  { %2007 = vmatpush1.bf16.msra.mxu0 %v4447_v44  ;;  %2093 = vmatpush1.bf16.msra.mxu1 %v4449_v1  ;;  %v5608_v44 = vshrl.u32 %v126_v43, 7  ;;  %v547_v1 = vld [vmem:[#allocation7 + $0x448] sm:$0xff] }
  0x95   :  { %2008 = vmatprep.subr.bf16.mxu0 %v4456_v48  ;;  %2094 = vmatprep.subr.bf16.mxu1 %v4458_v5 }
  0x96   :  { %v5611_v45 = vsub.s32 0, %v5608_v44  ;;  %v5617_v47 = vsub.s32 1, %v5608_v44  ;;  %v5622_v61 = vsub.s32 2, %v5608_v44  ;;  %v5625_v3 = vsub.s32 3, %v5608_v44 }
  0x98   :  { %2009 = vmatpush1.bf16.msra.mxu0 %v4455_v52  ;;  %2095 = vmatpush1.bf16.msra.mxu1 %v4457_v7  ;;  %v129_v48 = vrot.slane %v124_v46, %v5611_v45  ;;  %v133_v49 = vrot.slane %v124_v46, %v5617_v47  ;;  %v4514_v7 = vcombine.high %v547_v1, %v551_v2 }
  0x99   :  { %2010 = vmatprep.subr.bf16.mxu0 %v4464_v56  ;;  %2096 = vmatprep.subr.bf16.mxu1 %v4466_v11  ;;  %v137_v9 = vrot.slane %v124_v46, %v5622_v61  ;;  %v555_v11 = vld [vmem:[#allocation7 + $0x488] sm:$0xff]  ;;  %v141_v13 = vrot.slane %v124_v46, %v5625_v3 }
  0x9c   :  { %2011 = vmatpush1.bf16.msra.mxu0 %v4463_v60  ;;  %2097 = vmatpush1.bf16.msra.mxu1 %v4465_v12  ;;  %v546_v60 = vld [vmem:[#allocation7 + $0x440] sm:$0xff]  ;;  %v559_v12 = vld [vmem:[#allocation7 + $0x4a8] sm:$0xff] }
  0x9d   :  { %2012 = vmatprep.subr.bf16.mxu0 %v4472_v0  ;;  %2098 = vmatprep.subr.bf16.mxu1 %v4474_v15  ;;  %v550_v0 = vld [vmem:[#allocation7 + $0x460] sm:$0xff]  ;;  %v4513_v15 = vcombine.low %v547_v1, %v551_v2  ;;  %v4521_v31 = vcombine.low %v555_v11, %v559_v12 }
  0x9e   :  { %v4511_v14 = vcombine.low %v546_v60, %v550_v0 }
  0xa0   :  { %2013 = vmatpush1.bf16.msra.mxu0 %v4471_v4  ;;  %2099 = vmatpush1.bf16.msra.mxu1 %v4473_v16 }
  0xa1   :  { %2014 = vmatprep.subr.bf16.mxu0 %v4480_v6  ;;  %2100 = vmatprep.subr.bf16.mxu1 %v4482_v17  ;;  %v4512_v6 = vcombine.high %v546_v60, %v550_v0  ;;  %v590_v60 = vld [vmem:[#allocation7 + $0x5a0] sm:$0xff] }
  0xa4   :  { %2015 = vmatpush1.bf16.msra.mxu0 %v4479_v10  ;;  %2101 = vmatpush1.bf16.msra.mxu1 %v4481_v18  ;;  %v558_v10 = vld [vmem:[#allocation7 + $0x4a0] sm:$0xff]  ;;  %v4522_v18 = vcombine.high %v555_v11, %v559_v12 }
  0xa5   :  { %2016 = vmatprep.subr.bf16.mxu0 %v4488_v22  ;;  %2102 = vmatprep.subr.bf16.mxu1 %v4490_v26  ;;  %v4520_v17 = vcombine.high %v554_v8, %v558_v10  ;;  %v566_v22 = vld [vmem:[#allocation7 + $0x4e0] sm:$0xff] }
  0xa6   :  { %v4527_v43 = vcombine.low %v562_v19, %v566_v22 }
  0xa8   :  { %2017 = vmatpush1.bf16.msra.mxu0 %v4487_v24  ;;  %2103 = vmatpush1.bf16.msra.mxu1 %v4489_v25  ;;  %v567_v24 = vld [vmem:[#allocation7 + $0x4e8] sm:$0xff] }
  0xa9   :  { %2018 = vmatprep.subr.bf16.mxu0 %v4496_v30  ;;  %2104 = vmatprep.subr.bf16.mxu1 %v4498_v34  ;;  %v4519_v30 = vcombine.low %v554_v8, %v558_v10  ;;  %v4528_v34 = vcombine.high %v562_v19, %v566_v22  ;;  %v4530_v35 = vcombine.high %v563_v23, %v567_v24  ;;  %v598_v8 = vld [vmem:[#allocation7 + $0x5e0] sm:$0xff]  ;;  %v599_v10 = vld [vmem:[#allocation7 + $0x5e8] sm:$0xff] }
  0xaa   :  { %v4529_v46 = vcombine.low %v563_v23, %v567_v24  ;;  %v610_v23 = vld [vmem:[#allocation7 + $0x640] sm:$0xff] }
  0xab   :  { %v614_v24 = vld [vmem:[#allocation7 + $0x660] sm:$0xff] }
  0xac   :  { %2019 = vmatpush1.bf16.msra.mxu0 %v4495_v32  ;;  %2105 = vmatpush1.bf16.msra.mxu1 %v4497_v33 }
  0xad   :  { %2031 = vmatprep.subr.bf16.mxu0 %v4504_v38  ;;  %2117 = vmatprep.subr.bf16.mxu1 %v4506_v42  ;;  %v574_v38 = vld [vmem:[#allocation7 + $0x520] sm:$0xff] }
 0x142   :  { %v346_v50 = vpop.f32.mrb[0].mxu0  ;;  %v389_v16 = vpop.f32.mrb[0].mxu1 }
 0x143   :  { %v347_v51 = vadd.f32 %v346_v50, %v129_v48  ;;  %v348_v52 = vpop.f32.mrb[1].mxu0  ;;  %v390_v20 = vadd.f32 %v389_v16, %v137_v9  ;;  %v391_v21 = vpop.f32.mrb[1].mxu1  ;;  %v606_v16 = vld [vmem:[#allocation7 + $0x620] sm:$0xff] }
 0x144   :  { %v349_v53 = vadd.f32 %v348_v52, %v133_v49  ;;  %v350_v54 = vpop.f32.mrb[2].mxu0  ;;  %v392_v25 = vadd.f32 %v391_v21, %v141_v13  ;;  %v393_v26 = vpop.f32.mrb[2].mxu1  ;;  %v582_v52 = vld [vmem:[#allocation7 + $0x560] sm:$0xff] }
 0x145   :  { %v351_v55 = vadd.f32 %v350_v54, %v129_v48  ;;  %v352_v56 = vpop.f32.mrb[3].mxu0  ;;  %v398_v58 = vmax.f32 %v347_v51, 0.0  ;;  %v400_v27 = vmax.f32 %v390_v20, 0.0  ;;  %v394_v28 = vadd.f32 %v393_v26, %v137_v9  ;;  %v395_v29 = vpop.f32.mrb[3].mxu1  ;;  %v578_v51 = vld [vmem:[#allocation7 + $0x540] sm:$0xff]  ;;  %v583_v54 = vld [vmem:[#allocation7 + $0x568] sm:$0xff] }
 0x146   :  { %v353_v57 = vadd.f32 %v352_v56, %v133_v49  ;;  %v399_v62 = vmax.f32 %v349_v53, 0.0  ;;  %v401_v32 = vmax.f32 %v392_v25, 0.0  ;;  %v396_v33 = vadd.f32 %v395_v29, %v141_v13  ;;  %v579_v53 = vld [vmem:[#allocation7 + $0x548] sm:$0xff] }
 0x147   :  { %v402_v59 = vmax.f32 %v351_v55, 0.0  ;;  %v404_v37 = vmax.f32 %v394_v28, 0.0  ;;  %v4536_v49 = vcombine.high %v570_v36, %v574_v38  ;;  %v4535_v55 = vcombine.low %v570_v36, %v574_v38  ;;  %v595_v9 = vld [vmem:[#allocation7 + $0x5c8] sm:$0xff] }
 0x148   :  { %v403_v63 = vmax.f32 %v353_v57, 0.0  ;;  %v4544_v57 = vcombine.high %v578_v51, %v582_v52  ;;  %v4543_v0 = vcombine.low %v578_v51, %v582_v52  ;;  %v4545_v1 = vcombine.low %v579_v53, %v583_v54  ;;  %v611_v25 = vld [vmem:[#allocation7 + $0x648] sm:$0xff]  ;;  %v634_v52 = vld [vmem:[#allocation7 + $0x700] sm:$0xff] }
 0x149   :  { %v5627_v4 = vpack.c.bf16 %v402_v59, %v398_v58  ;;  %v5637_v42 = vpack.c.bf16 %v404_v37, %v400_v27  ;;  %v4546_v58 = vcombine.high %v579_v53, %v583_v54  ;;  %v586_v59 = vld [vmem:[#allocation7 + $0x580] sm:$0xff]  ;;  %v4561_v20 = vcombine.low %v595_v9, %v599_v10  ;;  %v615_v26 = vld [vmem:[#allocation7 + $0x668] sm:$0xff] }
 0x14a   :  { %v5629_v5 = vpack.c.bf16 %v403_v63, %v399_v62  ;;  %v587_v62 = vld [vmem:[#allocation7 + $0x588] sm:$0xff]  ;;  %v4552_v2 = vcombine.high %v586_v59, %v590_v60  ;;  %v4551_v11 = vcombine.low %v586_v59, %v590_v60  ;;  %v4576_v29 = vcombine.high %v610_v23, %v614_v24  ;;  %v638_v53 = vld [vmem:[#allocation7 + $0x720] sm:$0xff] }
 0x14b   :  { %v591_v63 = vld [vmem:[#allocation7 + $0x5a8] sm:$0xff]  ;;  %v4577_v36 = vcombine.low %v611_v25, %v615_v26  ;;  %v642_v60 = vld [vmem:[#allocation7 + $0x740] sm:$0xff] }
 0x14c   :  { %2020 = vmatprep.mubr.bf16.mxu0 %v5629_v5  ;;  %2106 = vmatprep.mubr.bf16.mxu1 %v5629_v5  ;;  %v4553_v12 = vcombine.low %v587_v62, %v591_v63  ;;  %v635_v54 = vld [vmem:[#allocation7 + $0x708] sm:$0xff] }
 0x14d   :  { %2021 = vmatmul.mubr.bf16.vlgmr.msra.gmra.mrb[4].mxu0 %v5627_v4  ;;  %2107 = vmatmul.mubr.bf16.vlgmr.msra.gmra.mrb[4].mxu1 %v5627_v4 }
 0x14e   :  { %2032 = vmatpush1.bf16.msra.mxu0 %v4503_v40  ;;  %2118 = vmatpush1.bf16.msra.mxu1 %v4505_v41  ;;  %v575_v40 = vld [vmem:[#allocation7 + $0x528] sm:$0xff]  ;;  %v405_v41 = vmax.f32 %v396_v33, 0.0 }
 0x14f   :  { %2033 = vmatprep.subr.bf16.mxu0 %v4512_v6  ;;  %2119 = vmatprep.subr.bf16.mxu1 %v4514_v7  ;;  %v4538_v50 = vcombine.high %v571_v39, %v575_v40  ;;  %v4537_v56 = vcombine.low %v571_v39, %v575_v40  ;;  %v4554_v6 = vcombine.high %v587_v62, %v591_v63  ;;  %v594_v7 = vld [vmem:[#allocation7 + $0x5c0] sm:$0xff]  ;;  %v619_v33 = vld [vmem:[#allocation7 + $0x688] sm:$0xff] }
 0x150   :  { %v5639_v48 = vpack.c.bf16 %v405_v41, %v401_v32  ;;  %v4560_v13 = vcombine.high %v594_v7, %v598_v8  ;;  %v4559_v19 = vcombine.low %v594_v7, %v598_v8  ;;  %v622_v32 = vld [vmem:[#allocation7 + $0x6a0] sm:$0xff]  ;;  %v627_v41 = vld [vmem:[#allocation7 + $0x6c8] sm:$0xff] }
 0x151   :  { %v626_v39 = vld [vmem:[#allocation7 + $0x6c0] sm:$0xff]  ;;  %v643_v63 = vld [vmem:[#allocation7 + $0x748] sm:$0xff] }
 0x152   :  { %2034 = vmatpush1.bf16.msra.mxu0 %v4511_v14  ;;  %2120 = vmatpush1.bf16.msra.mxu1 %v4513_v15  ;;  %v4562_v14 = vcombine.high %v595_v9, %v599_v10  ;;  %v602_v15 = vld [vmem:[#allocation7 + $0x600] sm:$0xff]  ;;  %v651_v10 = vld [vmem:[#allocation7 + $0x788] sm:$0xff] }
 0x153   :  { %2035 = vmatprep.subr.bf16.mxu0 %v4520_v17  ;;  %2121 = vmatprep.subr.bf16.mxu1 %v4522_v18  ;;  %v603_v17 = vld [vmem:[#allocation7 + $0x608] sm:$0xff]  ;;  %v4568_v21 = vcombine.high %v602_v15, %v606_v16  ;;  %v4567_v27 = vcombine.low %v602_v15, %v606_v16  ;;  %v630_v40 = vld [vmem:[#allocation7 + $0x6e0] sm:$0xff] }
 0x154   :  { %2063 = vmatprep.mubr.bf16.mxu0 %v5639_v48  ;;  %2149 = vmatprep.mubr.bf16.mxu1 %v5639_v48  ;;  %v607_v18 = vld [vmem:[#allocation7 + $0x628] sm:$0xff]  ;;  %v646_v62 = vld [vmem:[#allocation7 + $0x760] sm:$0xff] }
 0x155   :  { %v4570_v22 = vcombine.high %v603_v17, %v607_v18  ;;  %v4569_v28 = vcombine.low %v603_v17, %v607_v18  ;;  %v650_v8 = vld [vmem:[#allocation7 + $0x780] sm:$0xff]  ;;  %v659_v18 = vld [vmem:[#allocation7 + $0x7c8] sm:$0xff] }
 0x156   :  { %2036 = vmatpush1.bf16.msra.mxu0 %v4519_v30  ;;  %2122 = vmatpush1.bf16.msra.mxu1 %v4521_v31  ;;  %v4578_v30 = vcombine.high %v611_v25, %v615_v26  ;;  %v618_v31 = vld [vmem:[#allocation7 + $0x680] sm:$0xff]  ;;  %v416_v25 = vld [vmem:[#allocation7 + $0x30] sm:$0xff]  ;;  %v413_v26 = vld [vmem:[#allocation7 + $0x18] sm:$0xff] }
 0x157   :  { %2037 = vmatprep.subr.bf16.mxu0 %v4528_v34  ;;  %2123 = vmatprep.subr.bf16.mxu1 %v4530_v35  ;;  %v623_v34 = vld [vmem:[#allocation7 + $0x6a8] sm:$0xff]  ;;  %v4575_v35 = vcombine.low %v610_v23, %v614_v24  ;;  %v4584_v37 = vcombine.high %v618_v31, %v622_v32  ;;  %v654_v9 = vld [vmem:[#allocation7 + $0x7a0] sm:$0xff]  ;;  %v412_v24 = vld [vmem:[#allocation7 + $0x10] sm:$0xff] }
 0x158   :  { %v4586_v38 = vcombine.high %v619_v33, %v623_v34  ;;  %v658_v16 = vld [vmem:[#allocation7 + $0x7c0] sm:$0xff] }
 0x159   :  { %v662_v17 = vld [vmem:[#allocation7 + $0x7e0] sm:$0xff] }
 0x15a   :  { %2038 = vmatpush1.bf16.msra.mxu0 %v4527_v43  ;;  %2124 = vmatpush1.bf16.msra.mxu1 %v4529_v46  ;;  %v631_v43 = vld [vmem:[#allocation7 + $0x6e8] sm:$0xff]  ;;  %v4583_v46 = vcombine.low %v618_v31, %v622_v32  ;;  %v420_v32 = vld [vmem:[#allocation7 + $0x50] sm:$0xff] }
 0x15b   :  { %2039 = vmatprep.subr.bf16.mxu0 %v4536_v49  ;;  %2125 = vmatprep.subr.bf16.mxu1 %v4538_v50  ;;  %v4585_v49 = vcombine.low %v619_v33, %v623_v34  ;;  %v4592_v50 = vcombine.high %v626_v39, %v630_v40  ;;  %v4594_v51 = vcombine.high %v627_v41, %v631_v43  ;;  %v424_v33 = vld [vmem:[#allocation7 + $0x70] sm:$0xff]  ;;  %v421_v34 = vld [vmem:[#allocation7 + $0x58] sm:$0xff] }
 0x15e   :  { %2040 = vmatpush1.bf16.msra.mxu0 %v4535_v55  ;;  %2126 = vmatpush1.bf16.msra.mxu1 %v4537_v56  ;;  %v639_v55 = vld [vmem:[#allocation7 + $0x728] sm:$0xff]  ;;  %v4591_v56 = vcombine.low %v626_v39, %v630_v40  ;;  %v428_v40 = vld [vmem:[#allocation7 + $0x90] sm:$0xff] }
 0x15f   :  { %2041 = vmatprep.subr.bf16.mxu0 %v4544_v57  ;;  %2127 = vmatprep.subr.bf16.mxu1 %v4546_v58  ;;  %v4593_v57 = vcombine.low %v627_v41, %v631_v43  ;;  %v4600_v58 = vcombine.high %v634_v52, %v638_v53  ;;  %v4602_v59 = vcombine.high %v635_v54, %v639_v55  ;;  %v432_v41 = vld [vmem:[#allocation7 + $0xb0] sm:$0xff]  ;;  %v429_v43 = vld [vmem:[#allocation7 + $0x98] sm:$0xff] }
 0x162   :  { %2042 = vmatpush1.bf16.msra.mxu0 %v4543_v0  ;;  %2128 = vmatpush1.bf16.msra.mxu1 %v4545_v1  ;;  %v647_v0 = vld [vmem:[#allocation7 + $0x768] sm:$0xff]  ;;  %v4599_v1 = vcombine.low %v634_v52, %v638_v53  ;;  %v436_v53 = vld [vmem:[#allocation7 + $0xd0] sm:$0xff] }
 0x163   :  { %2043 = vmatprep.subr.bf16.mxu0 %v4552_v2  ;;  %2129 = vmatprep.subr.bf16.mxu1 %v4554_v6  ;;  %v4601_v2 = vcombine.low %v635_v54, %v639_v55  ;;  %v4608_v6 = vcombine.high %v642_v60, %v646_v62  ;;  %v4610_v7 = vcombine.high %v643_v63, %v647_v0  ;;  %v440_v54 = vld [vmem:[#allocation7 + $0xf0] sm:$0xff]  ;;  %v437_v55 = vld [vmem:[#allocation7 + $0xd8] sm:$0xff] }
 0x166   :  { %2044 = vmatpush1.bf16.msra.mxu0 %v4551_v11  ;;  %2130 = vmatpush1.bf16.msra.mxu1 %v4553_v12  ;;  %v655_v11 = vld [vmem:[#allocation7 + $0x7a8] sm:$0xff]  ;;  %v4607_v12 = vcombine.low %v642_v60, %v646_v62  ;;  %v444_v62 = vld [vmem:[#allocation7 + $0x110] sm:$0xff] }
 0x167   :  { %2045 = vmatprep.subr.bf16.mxu0 %v4560_v13  ;;  %2131 = vmatprep.subr.bf16.mxu1 %v4562_v14  ;;  %v4609_v13 = vcombine.low %v643_v63, %v647_v0  ;;  %v4616_v14 = vcombine.high %v650_v8, %v654_v9  ;;  %v4618_v15 = vcombine.high %v651_v10, %v655_v11  ;;  %v448_v63 = vld [vmem:[#allocation7 + $0x130] sm:$0xff]  ;;  %v449_v0 = vld [vmem:[#allocation7 + $0x138] sm:$0xff] }
 0x16a   :  { %2046 = vmatpush1.bf16.msra.mxu0 %v4559_v19  ;;  %2132 = vmatpush1.bf16.msra.mxu1 %v4561_v20  ;;  %v663_v19 = vld [vmem:[#allocation7 + $0x7e8] sm:$0xff]  ;;  %v4615_v20 = vcombine.low %v650_v8, %v654_v9  ;;  %v452_v8 = vld [vmem:[#allocation7 + $0x150] sm:$0xff] }
 0x16b   :  { %2047 = vmatprep.subr.bf16.mxu0 %v4568_v21  ;;  %2133 = vmatprep.subr.bf16.mxu1 %v4570_v22  ;;  %v4617_v21 = vcombine.low %v651_v10, %v655_v11  ;;  %v4624_v22 = vcombine.high %v658_v16, %v662_v17  ;;  %v4626_v23 = vcombine.high %v659_v18, %v663_v19  ;;  %v456_v9 = vld [vmem:[#allocation7 + $0x170] sm:$0xff]  ;;  %v453_v10 = vld [vmem:[#allocation7 + $0x158] sm:$0xff] }
 0x16c   :  { %v457_v11 = vld [vmem:[#allocation7 + $0x178] sm:$0xff] }
 0x16e   :  { %2048 = vmatpush1.bf16.msra.mxu0 %v4567_v27  ;;  %2134 = vmatpush1.bf16.msra.mxu1 %v4569_v28  ;;  %v417_v27 = vld [vmem:[#allocation7 + $0x38] sm:$0xff]  ;;  %v4623_v28 = vcombine.low %v658_v16, %v662_v17  ;;  %v460_v16 = vld [vmem:[#allocation7 + $0x190] sm:$0xff] }
 0x16f   :  { %2049 = vmatprep.subr.bf16.mxu0 %v4576_v29  ;;  %2135 = vmatprep.subr.bf16.mxu1 %v4578_v30  ;;  %v4625_v29 = vcombine.low %v659_v18, %v663_v19  ;;  %v4380_v30 = vcombine.high %v412_v24, %v416_v25  ;;  %v4382_v31 = vcombine.high %v413_v26, %v417_v27  ;;  %v464_v17 = vld [vmem:[#allocation7 + $0x1b0] sm:$0xff]  ;;  %v461_v18 = vld [vmem:[#allocation7 + $0x198] sm:$0xff] }
 0x170   :  { %v465_v19 = vld [vmem:[#allocation7 + $0x1b8] sm:$0xff] }
 0x172   :  { %2050 = vmatpush1.bf16.msra.mxu0 %v4575_v35  ;;  %2136 = vmatpush1.bf16.msra.mxu1 %v4577_v36  ;;  %v425_v35 = vld [vmem:[#allocation7 + $0x78] sm:$0xff]  ;;  %v4379_v36 = vcombine.low %v412_v24, %v416_v25  ;;  %v468_v24 = vld [vmem:[#allocation7 + $0x1d0] sm:$0xff] }
 0x173   :  { %2051 = vmatprep.subr.bf16.mxu0 %v4584_v37  ;;  %2137 = vmatprep.subr.bf16.mxu1 %v4586_v38  ;;  %v4381_v37 = vcombine.low %v413_v26, %v417_v27  ;;  %v4388_v38 = vcombine.high %v420_v32, %v424_v33  ;;  %v4390_v39 = vcombine.high %v421_v34, %v425_v35  ;;  %v472_v25 = vld [vmem:[#allocation7 + $0x1f0] sm:$0xff]  ;;  %v469_v26 = vld [vmem:[#allocation7 + $0x1d8] sm:$0xff] }
 0x174   :  { %v473_v27 = vld [vmem:[#allocation7 + $0x1f8] sm:$0xff] }
 0x176   :  { %2052 = vmatpush1.bf16.msra.mxu0 %v4583_v46  ;;  %2138 = vmatpush1.bf16.msra.mxu1 %v4585_v49  ;;  %v433_v46 = vld [vmem:[#allocation7 + $0xb8] sm:$0xff]  ;;  %v4387_v49 = vcombine.low %v420_v32, %v424_v33  ;;  %v476_v32 = vld [vmem:[#allocation7 + $0x210] sm:$0xff] }
 0x177   :  { %2053 = vmatprep.subr.bf16.mxu0 %v4592_v50  ;;  %2139 = vmatprep.subr.bf16.mxu1 %v4594_v51  ;;  %v4389_v50 = vcombine.low %v421_v34, %v425_v35  ;;  %v4396_v51 = vcombine.high %v428_v40, %v432_v41  ;;  %v4398_v52 = vcombine.high %v429_v43, %v433_v46  ;;  %v480_v33 = vld [vmem:[#allocation7 + $0x230] sm:$0xff]  ;;  %v477_v34 = vld [vmem:[#allocation7 + $0x218] sm:$0xff] }
 0x178   :  { %v481_v35 = vld [vmem:[#allocation7 + $0x238] sm:$0xff] }
 0x17a   :  { %2054 = vmatpush1.bf16.msra.mxu0 %v4591_v56  ;;  %2140 = vmatpush1.bf16.msra.mxu1 %v4593_v57  ;;  %v441_v56 = vld [vmem:[#allocation7 + $0xf8] sm:$0xff]  ;;  %v4395_v57 = vcombine.low %v428_v40, %v432_v41  ;;  %v484_v40 = vld [vmem:[#allocation7 + $0x250] sm:$0xff] }
 0x17b   :  { %2055 = vmatprep.subr.bf16.mxu0 %v4600_v58  ;;  %2141 = vmatprep.subr.bf16.mxu1 %v4602_v59  ;;  %v4397_v58 = vcombine.low %v429_v43, %v433_v46  ;;  %v4404_v59 = vcombine.high %v436_v53, %v440_v54  ;;  %v4406_v60 = vcombine.high %v437_v55, %v441_v56  ;;  %v488_v41 = vld [vmem:[#allocation7 + $0x270] sm:$0xff]  ;;  %v485_v43 = vld [vmem:[#allocation7 + $0x258] sm:$0xff] }
 0x17c   :  { %v489_v46 = vld [vmem:[#allocation7 + $0x278] sm:$0xff] }
 0x17e   :  { %2056 = vmatpush1.bf16.msra.mxu0 %v4599_v1  ;;  %2142 = vmatpush1.bf16.msra.mxu1 %v4601_v2  ;;  %v4403_v1 = vcombine.low %v436_v53, %v440_v54  ;;  %v4405_v2 = vcombine.low %v437_v55, %v441_v56  ;;  %v492_v53 = vld [vmem:[#allocation7 + $0x290] sm:$0xff]  ;;  %v493_v55 = vld [vmem:[#allocation7 + $0x298] sm:$0xff] }
 0x17f   :  { %2057 = vmatprep.subr.bf16.mxu0 %v4608_v6  ;;  %2143 = vmatprep.subr.bf16.mxu1 %v4610_v7  ;;  %v4412_v6 = vcombine.high %v444_v62, %v448_v63  ;;  %v496_v54 = vld [vmem:[#allocation7 + $0x2b0] sm:$0xff]  ;;  %v497_v56 = vld [vmem:[#allocation7 + $0x2b8] sm:$0xff] }
 0x182   :  { %2058 = vmatpush1.bf16.msra.mxu0 %v4607_v12  ;;  %2144 = vmatpush1.bf16.msra.mxu1 %v4609_v13  ;;  %v4411_v12 = vcombine.low %v444_v62, %v448_v63  ;;  %v500_v62 = vld [vmem:[#allocation7 + $0x2d0] sm:$0xff] }
 0x183   :  { %2059 = vmatprep.subr.bf16.mxu0 %v4616_v14  ;;  %2145 = vmatprep.subr.bf16.mxu1 %v4618_v15  ;;  %v4420_v14 = vcombine.high %v452_v8, %v456_v9  ;;  %v4422_v15 = vcombine.high %v453_v10, %v457_v11  ;;  %v504_v63 = vld [vmem:[#allocation7 + $0x2f0] sm:$0xff] }
 0x186   :  { %2060 = vmatpush1.bf16.msra.mxu0 %v4615_v20  ;;  %2146 = vmatpush1.bf16.msra.mxu1 %v4617_v21  ;;  %v4419_v20 = vcombine.low %v452_v8, %v456_v9  ;;  %v4421_v21 = vcombine.low %v453_v10, %v457_v11  ;;  %v508_v8 = vld [vmem:[#allocation7 + $0x310] sm:$0xff]  ;;  %v509_v10 = vld [vmem:[#allocation7 + $0x318] sm:$0xff] }
 0x187   :  { %2061 = vmatprep.subr.bf16.mxu0 %v4624_v22  ;;  %2147 = vmatprep.subr.bf16.mxu1 %v4626_v23  ;;  %v4428_v22 = vcombine.high %v460_v16, %v464_v17  ;;  %v4430_v23 = vcombine.high %v461_v18, %v465_v19  ;;  %v512_v9 = vld [vmem:[#allocation7 + $0x330] sm:$0xff]  ;;  %v513_v11 = vld [vmem:[#allocation7 + $0x338] sm:$0xff] }
 0x18a   :  { %2062 = vmatpush1.bf16.msra.mxu0 %v4623_v28  ;;  %2148 = vmatpush1.bf16.msra.mxu1 %v4625_v29  ;;  %v4427_v28 = vcombine.low %v460_v16, %v464_v17  ;;  %v4429_v29 = vcombine.low %v461_v18, %v465_v19  ;;  %v516_v16 = vld [vmem:[#allocation7 + $0x350] sm:$0xff]  ;;  %v517_v18 = vld [vmem:[#allocation7 + $0x358] sm:$0xff] }
 0x18b   :  { %2160 = vmatprep.subr.bf16.mxu0 %v4380_v30  ;;  %2246 = vmatprep.subr.bf16.mxu1 %v4382_v31  ;;  %v4436_v30 = vcombine.high %v468_v24, %v472_v25  ;;  %v4438_v31 = vcombine.high %v469_v26, %v473_v27  ;;  %v520_v17 = vld [vmem:[#allocation7 + $0x370] sm:$0xff]  ;;  %v521_v19 = vld [vmem:[#allocation7 + $0x378] sm:$0xff] }
 0x18d   :  { %2064 = vmatmul.mubr.bf16.vlgmr.msra.gmra.mrb[4].mxu0 %v5637_v42  ;;  %2150 = vmatmul.mubr.bf16.vlgmr.msra.gmra.mrb[4].mxu1 %v5637_v42 }
 0x18e   :  { %2161 = vmatpush1.bf16.msra.mxu0 %v4379_v36  ;;  %2192 = vmatprep.mubr.bf16.mxu0 %v5629_v5  ;;  %v4435_v36 = vcombine.low %v468_v24, %v472_v25  ;;  %v524_v24 = vld [vmem:[#allocation7 + $0x390] sm:$0xff] }
 0x18f   :  { %2247 = vmatpush1.bf16.msra.mxu1 %v4381_v37  ;;  %2278 = vmatprep.mubr.bf16.mxu1 %v5629_v5  ;;  %v445_v5 = vld [vmem:[#allocation7 + $0x118] sm:$0xff]  ;;  %v4437_v37 = vcombine.low %v469_v26, %v473_v27  ;;  %v528_v25 = vld [vmem:[#allocation7 + $0x3b0] sm:$0xff] }
 0x190   :  { %2162 = vmatprep.subr.bf16.mxu0 %v4388_v38  ;;  %2248 = vmatprep.subr.bf16.mxu1 %v4390_v39  ;;  %v4414_v7 = vcombine.high %v445_v5, %v449_v0  ;;  %v4413_v13 = vcombine.low %v445_v5, %v449_v0  ;;  %v4444_v38 = vcombine.high %v476_v32, %v480_v33  ;;  %v501_v5 = vld [vmem:[#allocation7 + $0x2d8] sm:$0xff] }
 0x191   :  { %v4446_v39 = vcombine.high %v477_v34, %v481_v35  ;;  %v505_v0 = vld [vmem:[#allocation7 + $0x2f8] sm:$0xff] }
 0x192   :  { %2163 = vmatpush1.bf16.msra.mxu0 %v4387_v49  ;;  %v4443_v49 = vcombine.low %v476_v32, %v480_v33  ;;  %v525_v26 = vld [vmem:[#allocation7 + $0x398] sm:$0xff]  ;;  %v532_v32 = vld [vmem:[#allocation7 + $0x3d0] sm:$0xff] }
 0x193   :  { %2249 = vmatpush1.bf16.msra.mxu1 %v4389_v50  ;;  %2164 = vmatprep.subr.bf16.mxu0 %v4396_v51  ;;  %v4445_v50 = vcombine.low %v477_v34, %v481_v35  ;;  %v4452_v51 = vcombine.high %v484_v40, %v488_v41  ;;  %v529_v27 = vld [vmem:[#allocation7 + $0x3b8] sm:$0xff]  ;;  %v536_v33 = vld [vmem:[#allocation7 + $0x3f0] sm:$0xff] }
 0x194   :  { %2250 = vmatprep.subr.bf16.mxu1 %v4398_v52  ;;  %v4454_v52 = vcombine.high %v485_v43, %v489_v46  ;;  %v533_v34 = vld [vmem:[#allocation7 + $0x3d8] sm:$0xff] }
 0x195   :  { %v537_v35 = vld [vmem:[#allocation7 + $0x3f8] sm:$0xff] }
 0x196   :  { %2165 = vmatpush1.bf16.msra.mxu0 %v4395_v57  ;;  %v4451_v57 = vcombine.low %v484_v40, %v488_v41  ;;  %v540_v40 = vld [vmem:[#allocation7 + $0x410] sm:$0xff] }
 0x197   :  { %2251 = vmatpush1.bf16.msra.mxu1 %v4397_v58  ;;  %2166 = vmatprep.subr.bf16.mxu0 %v4404_v59  ;;  %v4453_v58 = vcombine.low %v485_v43, %v489_v46  ;;  %v4460_v59 = vcombine.high %v492_v53, %v496_v54  ;;  %v544_v41 = vld [vmem:[#allocation7 + $0x430] sm:$0xff]  ;;  %v541_v43 = vld [vmem:[#allocation7 + $0x418] sm:$0xff] }
 0x198   :  { %2252 = vmatprep.subr.bf16.mxu1 %v4406_v60  ;;  %v4462_v60 = vcombine.high %v493_v55, %v497_v56  ;;  %v545_v46 = vld [vmem:[#allocation7 + $0x438] sm:$0xff] }
 0x19a   :  { %2167 = vmatpush1.bf16.msra.mxu0 %v4403_v1  ;;  %v4459_v1 = vcombine.low %v492_v53, %v496_v54  ;;  %v548_v53 = vld [vmem:[#allocation7 + $0x450] sm:$0xff] }
 0x19b   :  { %2253 = vmatpush1.bf16.msra.mxu1 %v4405_v2  ;;  %2168 = vmatprep.subr.bf16.mxu0 %v4412_v6  ;;  %v4461_v2 = vcombine.low %v493_v55, %v497_v56  ;;  %v4468_v6 = vcombine.high %v500_v62, %v504_v63  ;;  %v552_v54 = vld [vmem:[#allocation7 + $0x470] sm:$0xff]  ;;  %v4507_v55 = vcombine.low %v540_v40, %v544_v41  ;;  %v549_v56 = vld [vmem:[#allocation7 + $0x458] sm:$0xff] }
 0x19c   :  { %2254 = vmatprep.subr.bf16.mxu1 %v4414_v7  ;;  %v4470_v7 = vcombine.high %v501_v5, %v505_v0 }
 0x19e   :  { %2169 = vmatpush1.bf16.msra.mxu0 %v4411_v12  ;;  %v4467_v12 = vcombine.low %v500_v62, %v504_v63  ;;  %v560_v62 = vld [vmem:[#allocation7 + $0x4b0] sm:$0xff] }
 0x19f   :  { %2255 = vmatpush1.bf16.msra.mxu1 %v4413_v13  ;;  %2170 = vmatprep.subr.bf16.mxu0 %v4420_v14  ;;  %v4469_v13 = vcombine.low %v501_v5, %v505_v0  ;;  %v4476_v14 = vcombine.high %v508_v8, %v512_v9  ;;  %v557_v5 = vld [vmem:[#allocation7 + $0x498] sm:$0xff] }
 0x1a0   :  { %2256 = vmatprep.subr.bf16.mxu1 %v4422_v15  ;;  %v4478_v15 = vcombine.high %v509_v10, %v513_v11  ;;  %v561_v0 = vld [vmem:[#allocation7 + $0x4b8] sm:$0xff] }
 0x1a2   :  { %2171 = vmatpush1.bf16.msra.mxu0 %v4419_v20  ;;  %v4475_v20 = vcombine.low %v508_v8, %v512_v9  ;;  %v564_v8 = vld [vmem:[#allocation7 + $0x4d0] sm:$0xff] }
 0x1a3   :  { %2257 = vmatpush1.bf16.msra.mxu1 %v4421_v21  ;;  %2172 = vmatprep.subr.bf16.mxu0 %v4428_v22  ;;  %v4477_v21 = vcombine.low %v509_v10, %v513_v11  ;;  %v4484_v22 = vcombine.high %v516_v16, %v520_v17  ;;  %v568_v9 = vld [vmem:[#allocation7 + $0x4f0] sm:$0xff]  ;;  %v565_v10 = vld [vmem:[#allocation7 + $0x4d8] sm:$0xff] }
 0x1a4   :  { %2258 = vmatprep.subr.bf16.mxu1 %v4430_v23  ;;  %v4486_v23 = vcombine.high %v517_v18, %v521_v19  ;;  %v569_v11 = vld [vmem:[#allocation7 + $0x4f8] sm:$0xff] }
 0x1a6   :  { %2173 = vmatpush1.bf16.msra.mxu0 %v4427_v28  ;;  %v4483_v28 = vcombine.low %v516_v16, %v520_v17  ;;  %v576_v16 = vld [vmem:[#allocation7 + $0x530] sm:$0xff]  ;;  %v573_v17 = vld [vmem:[#allocation7 + $0x518] sm:$0xff] }
 0x1a7   :  { %2259 = vmatpush1.bf16.msra.mxu1 %v4429_v29  ;;  %2174 = vmatprep.subr.bf16.mxu0 %v4436_v30  ;;  %v4485_v29 = vcombine.low %v517_v18, %v521_v19  ;;  %v4492_v30 = vcombine.high %v524_v24, %v528_v25  ;;  %v577_v18 = vld [vmem:[#allocation7 + $0x538] sm:$0xff]  ;;  %v4533_v19 = vcombine.low %v565_v10, %v569_v11 }
 0x1a8   :  { %2260 = vmatprep.subr.bf16.mxu1 %v4438_v31  ;;  %v4494_v31 = vcombine.high %v525_v26, %v529_v27 }
 0x1aa   :  { %2175 = vmatpush1.bf16.msra.mxu0 %v4435_v36  ;;  %v4491_v36 = vcombine.low %v524_v24, %v528_v25  ;;  %v581_v24 = vld [vmem:[#allocation7 + $0x558] sm:$0xff] }
 0x1ab   :  { %2261 = vmatpush1.bf16.msra.mxu1 %v4437_v37  ;;  %2176 = vmatprep.subr.bf16.mxu0 %v4444_v38  ;;  %v4493_v37 = vcombine.low %v525_v26, %v529_v27  ;;  %v4500_v38 = vcombine.high %v532_v32, %v536_v33  ;;  %v585_v25 = vld [vmem:[#allocation7 + $0x578] sm:$0xff]  ;;  %v4541_v27 = vcombine.low %v573_v17, %v577_v18 }
 0x1ac   :  { %2262 = vmatprep.subr.bf16.mxu1 %v4446_v39  ;;  %v4502_v39 = vcombine.high %v533_v34, %v537_v35 }
 0x1ae   :  { %2177 = vmatpush1.bf16.msra.mxu0 %v4443_v49  ;;  %v4499_v49 = vcombine.low %v532_v32, %v536_v33  ;;  %v589_v32 = vld [vmem:[#allocation7 + $0x598] sm:$0xff] }
 0x1af   :  { %2263 = vmatpush1.bf16.msra.mxu1 %v4445_v50  ;;  %2178 = vmatprep.subr.bf16.mxu0 %v4452_v51  ;;  %v4501_v50 = vcombine.low %v533_v34, %v537_v35  ;;  %v4508_v51 = vcombine.high %v540_v40, %v544_v41  ;;  %v593_v33 = vld [vmem:[#allocation7 + $0x5b8] sm:$0xff]  ;;  %v4549_v35 = vcombine.low %v581_v24, %v585_v25 }
 0x1b0   :  { %2264 = vmatprep.subr.bf16.mxu1 %v4454_v52  ;;  %v4510_v52 = vcombine.high %v541_v43, %v545_v46  ;;  %v597_v40 = vld [vmem:[#allocation7 + $0x5d8] sm:$0xff] }
 0x1b1   :  { %v601_v41 = vld [vmem:[#allocation7 + $0x5f8] sm:$0xff] }
 0x1b2   :  { %2179 = vmatpush1.bf16.msra.mxu0 %v4451_v57  ;;  %v553_v57 = vld [vmem:[#allocation7 + $0x478] sm:$0xff] }
 0x1b3   :  { %2265 = vmatpush1.bf16.msra.mxu1 %v4453_v58  ;;  %2180 = vmatprep.subr.bf16.mxu0 %v4460_v59  ;;  %v4509_v58 = vcombine.low %v541_v43, %v545_v46  ;;  %v4516_v59 = vcombine.high %v548_v53, %v552_v54  ;;  %v4518_v63 = vcombine.high %v549_v56, %v553_v57 }
 0x1b4   :  { %2266 = vmatprep.subr.bf16.mxu1 %v4462_v60  ;;  %v556_v60 = vld [vmem:[#allocation7 + $0x490] sm:$0xff]  ;;  %v4557_v46 = vcombine.low %v589_v32, %v593_v33 }
 0x1b6   :  { %2181 = vmatpush1.bf16.msra.mxu0 %v4459_v1  ;;  %v4515_v1 = vcombine.low %v548_v53, %v552_v54  ;;  %v605_v53 = vld [vmem:[#allocation7 + $0x618] sm:$0xff] }
 0x1b7   :  { %2267 = vmatpush1.bf16.msra.mxu1 %v4461_v2  ;;  %2182 = vmatprep.subr.bf16.mxu0 %v4468_v6  ;;  %v4517_v2 = vcombine.low %v549_v56, %v553_v57  ;;  %v4524_v6 = vcombine.high %v556_v60, %v560_v62  ;;  %v609_v54 = vld [vmem:[#allocation7 + $0x638] sm:$0xff]  ;;  %v4565_v56 = vcombine.low %v597_v40, %v601_v41 }
 0x1b8   :  { %2268 = vmatprep.subr.bf16.mxu1 %v4470_v7  ;;  %v4526_v7 = vcombine.high %v557_v5, %v561_v0 }
 0x1ba   :  { %2183 = vmatpush1.bf16.msra.mxu0 %v4467_v12  ;;  %v4523_v12 = vcombine.low %v556_v60, %v560_v62  ;;  %v616_v60 = vld [vmem:[#allocation7 + $0x670] sm:$0xff]  ;;  %v613_v62 = vld [vmem:[#allocation7 + $0x658] sm:$0xff] }
 0x1bb   :  { %2269 = vmatpush1.bf16.msra.mxu1 %v4469_v13  ;;  %2184 = vmatprep.subr.bf16.mxu0 %v4476_v14  ;;  %v4532_v13 = vcombine.high %v564_v8, %v568_v9  ;;  %v4534_v14 = vcombine.high %v565_v10, %v569_v11 }
 0x1bc   :  { %2270 = vmatprep.subr.bf16.mxu1 %v4478_v15  ;;  %v572_v15 = vld [vmem:[#allocation7 + $0x510] sm:$0xff] }
 0x1bd   :  { %v4539_v26 = vcombine.low %v572_v15, %v576_v16 }
 0x1be   :  { %2185 = vmatpush1.bf16.msra.mxu0 %v4475_v20  ;;  %v4540_v20 = vcombine.high %v572_v15, %v576_v16  ;;  %v629_v15 = vld [vmem:[#allocation7 + $0x6d8] sm:$0xff] }
 0x1bf   :  { %2271 = vmatpush1.bf16.msra.mxu1 %v4477_v21  ;;  %2186 = vmatprep.subr.bf16.mxu0 %v4484_v22  ;;  %v4542_v21 = vcombine.high %v573_v17, %v577_v18  ;;  %v580_v22 = vld [vmem:[#allocation7 + $0x550] sm:$0xff]  ;;  %v633_v16 = vld [vmem:[#allocation7 + $0x6f8] sm:$0xff] }
 0x1c0   :  { %2272 = vmatprep.subr.bf16.mxu1 %v4486_v23  ;;  %v584_v23 = vld [vmem:[#allocation7 + $0x570] sm:$0xff] }
 0x1c1   :  { %v4547_v34 = vcombine.low %v580_v22, %v584_v23 }
 0x1c2   :  { %2187 = vmatpush1.bf16.msra.mxu0 %v4483_v28  ;;  %v4548_v28 = vcombine.high %v580_v22, %v584_v23  ;;  %v637_v22 = vld [vmem:[#allocation7 + $0x718] sm:$0xff] }
 0x1c3   :  { %2273 = vmatpush1.bf16.msra.mxu1 %v4485_v29  ;;  %2188 = vmatprep.subr.bf16.mxu0 %v4492_v30  ;;  %v4550_v29 = vcombine.high %v581_v24, %v585_v25  ;;  %v588_v30 = vld [vmem:[#allocation7 + $0x590] sm:$0xff]  ;;  %v641_v23 = vld [vmem:[#allocation7 + $0x738] sm:$0xff]  ;;  %v4597_v25 = vcombine.low %v629_v15, %v633_v16 }
 0x1c4   :  { %2274 = vmatprep.subr.bf16.mxu1 %v4494_v31  ;;  %v592_v31 = vld [vmem:[#allocation7 + $0x5b0] sm:$0xff] }
 0x1c5   :  { %v4555_v43 = vcombine.low %v588_v30, %v592_v31 }
 0x1c6   :  { %2189 = vmatpush1.bf16.msra.mxu0 %v4491_v36  ;;  %v4556_v36 = vcombine.high %v588_v30, %v592_v31  ;;  %v645_v30 = vld [vmem:[#allocation7 + $0x758] sm:$0xff] }
 0x1c7   :  { %2275 = vmatpush1.bf16.msra.mxu1 %v4493_v37  ;;  %2190 = vmatprep.subr.bf16.mxu0 %v4500_v38  ;;  %v4558_v37 = vcombine.high %v589_v32, %v593_v33  ;;  %v596_v38 = vld [vmem:[#allocation7 + $0x5d0] sm:$0xff]  ;;  %v649_v31 = vld [vmem:[#allocation7 + $0x778] sm:$0xff]  ;;  %v4605_v33 = vcombine.low %v637_v22, %v641_v23 }
 0x1c8   :  { %2276 = vmatprep.subr.bf16.mxu1 %v4502_v39  ;;  %v600_v39 = vld [vmem:[#allocation7 + $0x5f0] sm:$0xff] }
 0x1ca   :  { %2191 = vmatpush1.bf16.msra.mxu0 %v4499_v49  ;;  %v4564_v49 = vcombine.high %v596_v38, %v600_v39 }
 0x1cb   :  { %2277 = vmatpush1.bf16.msra.mxu1 %v4501_v50  ;;  %2203 = vmatprep.subr.bf16.mxu0 %v4508_v51  ;;  %v4566_v50 = vcombine.high %v597_v40, %v601_v41  ;;  %v604_v51 = vld [vmem:[#allocation7 + $0x610] sm:$0xff]  ;;  %v4613_v41 = vcombine.low %v645_v30, %v649_v31 }
 0x1cc   :  { %2289 = vmatprep.subr.bf16.mxu1 %v4510_v52  ;;  %v608_v52 = vld [vmem:[#allocation7 + $0x630] sm:$0xff] }
 0x1cd   :  { %2193 = vmatmul.mubr.bf16.vlgmr.msra.gmra.mrb[8].mxu0 %v5627_v4  ;;  %v4572_v57 = vcombine.high %v604_v51, %v608_v52 }
 0x1ce   :  { %2279 = vmatmul.mubr.bf16.vlgmr.msra.gmra.mrb[8].mxu1 %v5627_v4  ;;  %2204 = vmatpush1.bf16.msra.mxu0 %v4507_v55  ;;  %v4525_v4 = vcombine.low %v557_v5, %v561_v0  ;;  %v4563_v55 = vcombine.low %v596_v38, %v600_v39  ;;  %v4571_v5 = vcombine.low %v604_v51, %v608_v52  ;;  %v653_v38 = vld [vmem:[#allocation7 + $0x798] sm:$0xff] }
 0x1cf   :  { %2235 = vmatprep.mubr.bf16.mxu0 %v5639_v48  ;;  %2290 = vmatpush1.bf16.msra.mxu1 %v4509_v58  ;;  %v4574_v58 = vcombine.high %v605_v53, %v609_v54  ;;  %v4573_v0 = vcombine.low %v605_v53, %v609_v54  ;;  %v657_v39 = vld [vmem:[#allocation7 + $0x7b8] sm:$0xff] }
 0x1d0   :  { %2321 = vmatprep.mubr.bf16.mxu1 %v5639_v48  ;;  %2205 = vmatprep.subr.bf16.mxu0 %v4516_v59  ;;  %v4531_v48 = vcombine.low %v564_v8, %v568_v9  ;;  %v612_v59 = vld [vmem:[#allocation7 + $0x650] sm:$0xff]  ;;  %v621_v8 = vld [vmem:[#allocation7 + $0x698] sm:$0xff]  ;;  %v4621_v54 = vcombine.low %v653_v38, %v657_v39 }
 0x1d1   :  { %2291 = vmatprep.subr.bf16.mxu1 %v4518_v63  ;;  %v617_v63 = vld [vmem:[#allocation7 + $0x678] sm:$0xff]  ;;  %v4579_v10 = vcombine.low %v612_v59, %v616_v60 }
 0x1d2   :  { %2206 = vmatpush1.bf16.msra.mxu0 %v4515_v1  ;;  %v4580_v1 = vcombine.high %v612_v59, %v616_v60  ;;  %v625_v9 = vld [vmem:[#allocation7 + $0x6b8] sm:$0xff]  ;;  %v4581_v11 = vcombine.low %v613_v62, %v617_v63  ;;  %v5014_v59 = vld [vmem:[#allocation8 + $0x4] ss:$16 sps:$4 sm:$0xff]  }
 0x1d3   :  { %2292 = vmatpush1.bf16.msra.mxu1 %v4517_v2  ;;  %2207 = vmatprep.subr.bf16.mxu0 %v4524_v6  ;;  %v4582_v2 = vcombine.high %v613_v62, %v617_v63  ;;  %v620_v6 = vld [vmem:[#allocation7 + $0x690] sm:$0xff]  ;;  %v4589_v18 = vcombine.low %v621_v8, %v625_v9  ;;  %v661_v51 = vld [vmem:[#allocation7 + $0x7d8] sm:$0xff] }
 0x1d4   :  { %2293 = vmatprep.subr.bf16.mxu1 %v4526_v7  ;;  %v624_v7 = vld [vmem:[#allocation7 + $0x6b0] sm:$0xff]  ;;  %v665_v52 = vld [vmem:[#allocation7 + $0x7f8] sm:$0xff] }
 0x1d5   :  { %v4587_v17 = vcombine.low %v620_v6, %v624_v7  ;;  %v5017_v60 = vld [vmem:[#allocation8 + $0xc] ss:$16 sps:$4 sm:$0xff]   ;;  %v5012_v62 = vld [vmem:[#allocation8] ss:$16 sps:$4 sm:$0xff]   ;;  %v5015_v63 = vld [vmem:[#allocation8 + $0x8] ss:$16 sps:$4 sm:$0xff]  }
 0x1d6   :  { %2208 = vmatpush1.bf16.msra.mxu0 %v4523_v12  ;;  %v4588_v12 = vcombine.high %v620_v6, %v624_v7  ;;  %v5026_v6 = vld [vmem:[#allocation8 + $0x44] ss:$16 sps:$4 sm:$0xff]   ;;  %v5029_v7 = vld [vmem:[#allocation8 + $0x4c] ss:$16 sps:$4 sm:$0xff]  }
 0x1d7   :  { %2294 = vmatpush1.bf16.msra.mxu1 %v4525_v4  ;;  %2209 = vmatprep.subr.bf16.mxu0 %v4532_v13  ;;  %v4590_v4 = vcombine.high %v621_v8, %v625_v9  ;;  %v628_v13 = vld [vmem:[#allocation7 + $0x6d0] sm:$0xff]  ;;  %v5027_v9 = vld [vmem:[#allocation8 + $0x48] ss:$16 sps:$4 sm:$0xff]  }
 0x1d8   :  { %2295 = vmatprep.subr.bf16.mxu1 %v4534_v14  ;;  %v632_v14 = vld [vmem:[#allocation7 + $0x6f0] sm:$0xff] }
 0x1d9   :  { %v4595_v24 = vcombine.low %v628_v13, %v632_v14  ;;  %v5024_v8 = vld [vmem:[#allocation8 + $0x40] ss:$16 sps:$4 sm:$0xff]  }
 0x1da   :  { %2210 = vmatpush1.bf16.msra.mxu0 %v4531_v48  ;;  %v4596_v48 = vcombine.high %v628_v13, %v632_v14  ;;  %v5041_v13 = vld [vmem:[#allocation8 + $0x8c] ss:$16 sps:$4 sm:$0xff]   ;;  %v5036_v14 = vld [vmem:[#allocation8 + $0x80] ss:$16 sps:$4 sm:$0xff]  }
 0x1db   :  { %2296 = vmatpush1.bf16.msra.mxu1 %v4533_v19  ;;  %2211 = vmatprep.subr.bf16.mxu0 %v4540_v20  ;;  %v4598_v19 = vcombine.high %v629_v15, %v633_v16  ;;  %v636_v20 = vld [vmem:[#allocation7 + $0x710] sm:$0xff]  ;;  %v5039_v15 = vld [vmem:[#allocation8 + $0x88] ss:$16 sps:$4 sm:$0xff]  }
 0x1dc   :  { %2297 = vmatprep.subr.bf16.mxu1 %v4542_v21  ;;  %v640_v21 = vld [vmem:[#allocation7 + $0x730] sm:$0xff] }
 0x1dd   :  { %v4603_v32 = vcombine.low %v636_v20, %v640_v21  ;;  %v5044_v16 = vld [vmem:[#allocation8 + $0xa4] ss:$16 sps:$4 sm:$0xff]  }
 0x1de   :  { %2212 = vmatpush1.bf16.msra.mxu0 %v4539_v26  ;;  %v4604_v26 = vcombine.high %v636_v20, %v640_v21  ;;  %v5053_v20 = vld [vmem:[#allocation8 + $0xcc] ss:$16 sps:$4 sm:$0xff]   ;;  %v5048_v21 = vld [vmem:[#allocation8 + $0xc0] ss:$16 sps:$4 sm:$0xff]  }
 0x1df   :  { %2298 = vmatpush1.bf16.msra.mxu1 %v4541_v27  ;;  %2213 = vmatprep.subr.bf16.mxu0 %v4548_v28  ;;  %v4606_v27 = vcombine.high %v637_v22, %v641_v23  ;;  %v644_v28 = vld [vmem:[#allocation7 + $0x750] sm:$0xff]  ;;  %v5051_v22 = vld [vmem:[#allocation8 + $0xc8] ss:$16 sps:$4 sm:$0xff]  }
 0x1e0   :  { %2299 = vmatprep.subr.bf16.mxu1 %v4550_v29  ;;  %v648_v29 = vld [vmem:[#allocation7 + $0x770] sm:$0xff] }
 0x1e1   :  { %v4611_v40 = vcombine.low %v644_v28, %v648_v29  ;;  %v5056_v23 = vld [vmem:[#allocation8 + $0xe4] ss:$16 sps:$4 sm:$0xff]  }
 0x1e2   :  { %2214 = vmatpush1.bf16.msra.mxu0 %v4547_v34  ;;  %v4612_v34 = vcombine.high %v644_v28, %v648_v29  ;;  %v5065_v28 = vld [vmem:[#allocation8 + $0x10c] ss:$16 sps:$4 sm:$0xff]   ;;  %v5060_v29 = vld [vmem:[#allocation8 + $0x100] ss:$16 sps:$4 sm:$0xff]  }
 0x1e3   :  { %2300 = vmatpush1.bf16.msra.mxu1 %v4549_v35  ;;  %2215 = vmatprep.subr.bf16.mxu0 %v4556_v36  ;;  %v4614_v35 = vcombine.high %v645_v30, %v649_v31  ;;  %v652_v36 = vld [vmem:[#allocation7 + $0x790] sm:$0xff]  ;;  %v5063_v30 = vld [vmem:[#allocation8 + $0x108] ss:$16 sps:$4 sm:$0xff]  }
 0x1e4   :  { %2301 = vmatprep.subr.bf16.mxu1 %v4558_v37  ;;  %v656_v37 = vld [vmem:[#allocation7 + $0x7b0] sm:$0xff] }
 0x1e5   :  { %v4619_v53 = vcombine.low %v652_v36, %v656_v37  ;;  %v5068_v31 = vld [vmem:[#allocation8 + $0x124] ss:$16 sps:$4 sm:$0xff]  }
 0x1e6   :  { %2216 = vmatpush1.bf16.msra.mxu0 %v4555_v43  ;;  %v4620_v43 = vcombine.high %v652_v36, %v656_v37  ;;  %v5077_v36 = vld [vmem:[#allocation8 + $0x14c] ss:$16 sps:$4 sm:$0xff]   ;;  %v5072_v37 = vld [vmem:[#allocation8 + $0x140] ss:$16 sps:$4 sm:$0xff]  }
 0x1e7   :  { %2302 = vmatpush1.bf16.msra.mxu1 %v4557_v46  ;;  %2217 = vmatprep.subr.bf16.mxu0 %v4564_v49  ;;  %v4622_v46 = vcombine.high %v653_v38, %v657_v39  ;;  %v660_v49 = vld [vmem:[#allocation7 + $0x7d0] sm:$0xff]  ;;  %v5075_v38 = vld [vmem:[#allocation8 + $0x148] ss:$16 sps:$4 sm:$0xff]  }
 0x1e8   :  { %2303 = vmatprep.subr.bf16.mxu1 %v4566_v50  ;;  %v664_v50 = vld [vmem:[#allocation7 + $0x7f0] sm:$0xff] }
 0x1e9   :  { %v5080_v39 = vld [vmem:[#allocation8 + $0x164] ss:$16 sps:$4 sm:$0xff]  }
 0x1ea   :  { %2218 = vmatpush1.bf16.msra.mxu0 %v4563_v55  ;;  %v4628_v55 = vcombine.high %v660_v49, %v664_v50 }
 0x1eb   :  { %2304 = vmatpush1.bf16.msra.mxu1 %v4565_v56  ;;  %2219 = vmatprep.subr.bf16.mxu0 %v4572_v57  ;;  %v4630_v56 = vcombine.high %v661_v51, %v665_v52  ;;  %v4627_v57 = vcombine.low %v660_v49, %v664_v50  ;;  %v5089_v49 = vld [vmem:[#allocation8 + $0x18c] ss:$16 sps:$4 sm:$0xff]   ;;  %v5084_v50 = vld [vmem:[#allocation8 + $0x180] ss:$16 sps:$4 sm:$0xff]  }
 0x1ec   :  { %2305 = vmatprep.subr.bf16.mxu1 %v4574_v58  ;;  %v4629_v58 = vcombine.low %v661_v51, %v665_v52  ;;  %v5087_v51 = vld [vmem:[#allocation8 + $0x188] ss:$16 sps:$4 sm:$0xff]   ;;  %v5092_v52 = vld [vmem:[#allocation8 + $0x1a4] ss:$16 sps:$4 sm:$0xff]  }
 0x1ee   :  { %2220 = vmatpush1.bf16.msra.mxu0 %v4571_v5  ;;  %v5020_v5 = vld [vmem:[#allocation8 + $0x24] ss:$16 sps:$4 sm:$0xff]  }
 0x1ef   :  { %2306 = vmatpush1.bf16.msra.mxu1 %v4573_v0  ;;  %2221 = vmatprep.subr.bf16.mxu0 %v4580_v1  ;;  %v5023_v0 = vld [vmem:[#allocation8 + $0x2c] ss:$16 sps:$4 sm:$0xff]   ;;  %v5018_v1 = vld [vmem:[#allocation8 + $0x20] ss:$16 sps:$4 sm:$0xff]  }
 0x1f0   :  { %2307 = vmatprep.subr.bf16.mxu1 %v4582_v2  ;;  %v5021_v2 = vld [vmem:[#allocation8 + $0x28] ss:$16 sps:$4 sm:$0xff]  }
 0x1f2   :  { %2222 = vmatpush1.bf16.msra.mxu0 %v4579_v10  ;;  %v5032_v10 = vld [vmem:[#allocation8 + $0x64] ss:$16 sps:$4 sm:$0xff]  }
 0x1f3   :  { %2308 = vmatpush1.bf16.msra.mxu1 %v4581_v11  ;;  %2223 = vmatprep.subr.bf16.mxu0 %v4588_v12  ;;  %v5035_v11 = vld [vmem:[#allocation8 + $0x6c] ss:$16 sps:$4 sm:$0xff]   ;;  %v5030_v12 = vld [vmem:[#allocation8 + $0x60] ss:$16 sps:$4 sm:$0xff]  }
 0x1f4   :  { %2309 = vmatprep.subr.bf16.mxu1 %v4590_v4  ;;  %v5038_v4 = vld [vmem:[#allocation8 + $0x84] ss:$16 sps:$4 sm:$0xff]  }
 0x1f6   :  { %2224 = vmatpush1.bf16.msra.mxu0 %v4587_v17  ;;  %v5047_v17 = vld [vmem:[#allocation8 + $0xac] ss:$16 sps:$4 sm:$0xff]  }
 0x1f7   :  { %2310 = vmatpush1.bf16.msra.mxu1 %v4589_v18  ;;  %2225 = vmatprep.subr.bf16.mxu0 %v4596_v48  ;;  %v5042_v18 = vld [vmem:[#allocation8 + $0xa0] ss:$16 sps:$4 sm:$0xff]   ;;  %v5045_v48 = vld [vmem:[#allocation8 + $0xa8] ss:$16 sps:$4 sm:$0xff]  }
 0x1f8   :  { %2311 = vmatprep.subr.bf16.mxu1 %v4598_v19  ;;  %v5050_v19 = vld [vmem:[#allocation8 + $0xc4] ss:$16 sps:$4 sm:$0xff]  }
 0x1fa   :  { %2226 = vmatpush1.bf16.msra.mxu0 %v4595_v24  ;;  %v5059_v24 = vld [vmem:[#allocation8 + $0xec] ss:$16 sps:$4 sm:$0xff]  }
 0x1fb   :  { %2312 = vmatpush1.bf16.msra.mxu1 %v4597_v25  ;;  %2227 = vmatprep.subr.bf16.mxu0 %v4604_v26  ;;  %v5054_v25 = vld [vmem:[#allocation8 + $0xe0] ss:$16 sps:$4 sm:$0xff]   ;;  %v5057_v26 = vld [vmem:[#allocation8 + $0xe8] ss:$16 sps:$4 sm:$0xff]  }
 0x1fc   :  { %2313 = vmatprep.subr.bf16.mxu1 %v4606_v27  ;;  %v5062_v27 = vld [vmem:[#allocation8 + $0x104] ss:$16 sps:$4 sm:$0xff]  }
 0x1fe   :  { %2228 = vmatpush1.bf16.msra.mxu0 %v4603_v32  ;;  %v5071_v32 = vld [vmem:[#allocation8 + $0x12c] ss:$16 sps:$4 sm:$0xff]  }
 0x1ff   :  { %2314 = vmatpush1.bf16.msra.mxu1 %v4605_v33  ;;  %2229 = vmatprep.subr.bf16.mxu0 %v4612_v34  ;;  %v5066_v33 = vld [vmem:[#allocation8 + $0x120] ss:$16 sps:$4 sm:$0xff]   ;;  %v5069_v34 = vld [vmem:[#allocation8 + $0x128] ss:$16 sps:$4 sm:$0xff]  }
 0x200   :  { %2315 = vmatprep.subr.bf16.mxu1 %v4614_v35  ;;  %v5074_v35 = vld [vmem:[#allocation8 + $0x144] ss:$16 sps:$4 sm:$0xff]  }
 0x202   :  { %2230 = vmatpush1.bf16.msra.mxu0 %v4611_v40  ;;  %v5083_v40 = vld [vmem:[#allocation8 + $0x16c] ss:$16 sps:$4 sm:$0xff]  }
 0x203   :  { %2316 = vmatpush1.bf16.msra.mxu1 %v4613_v41  ;;  %2231 = vmatprep.subr.bf16.mxu0 %v4620_v43  ;;  %v5078_v41 = vld [vmem:[#allocation8 + $0x160] ss:$16 sps:$4 sm:$0xff]   ;;  %v5081_v43 = vld [vmem:[#allocation8 + $0x168] ss:$16 sps:$4 sm:$0xff]  }
 0x204   :  { %2317 = vmatprep.subr.bf16.mxu1 %v4622_v46  ;;  %v5086_v46 = vld [vmem:[#allocation8 + $0x184] ss:$16 sps:$4 sm:$0xff]  }
 0x206   :  { %2232 = vmatpush1.bf16.msra.mxu0 %v4619_v53  ;;  %v5095_v53 = vld [vmem:[#allocation8 + $0x1ac] ss:$16 sps:$4 sm:$0xff]  }
 0x207   :  { %2318 = vmatpush1.bf16.msra.mxu1 %v4621_v54  ;;  %2233 = vmatprep.subr.bf16.mxu0 %v4628_v55  ;;  %v5090_v54 = vld [vmem:[#allocation8 + $0x1a0] ss:$16 sps:$4 sm:$0xff]   ;;  %v5093_v55 = vld [vmem:[#allocation8 + $0x1a8] ss:$16 sps:$4 sm:$0xff]  }
 0x208   :  { %2319 = vmatprep.subr.bf16.mxu1 %v4630_v56  ;;  %v5098_v56 = vld [vmem:[#allocation8 + $0x1c4] ss:$16 sps:$4 sm:$0xff]  }
 0x20a   :  { %2234 = vmatpush1.bf16.msra.mxu0 %v4627_v57  ;;  %v5101_v57 = vld [vmem:[#allocation8 + $0x1cc] ss:$16 sps:$4 sm:$0xff]  }
 0x20b   :  { %2320 = vmatpush1.bf16.msra.mxu1 %v4629_v58  ;;  %3914 = vmatprep.subr.bf16.mxu0 %v5014_v59  ;;  %v5096_v58 = vld [vmem:[#allocation8 + $0x1c0] ss:$16 sps:$4 sm:$0xff]   ;;  %v5099_v59 = vld [vmem:[#allocation8 + $0x1c8] ss:$16 sps:$4 sm:$0xff]  }
 0x20c   :  { %4086 = vmatprep.subr.bf16.mxu1 %v5017_v60  ;;  %v5104_v60 = vld [vmem:[#allocation8 + $0x1e4] ss:$16 sps:$4 sm:$0xff]  }
 0x20d   :  { %2236 = vmatmul.mubr.bf16.vlgmr.msra.gmra.mrb[8].mxu0 %v5637_v42 }
 0x20e   :  { %2322 = vmatmul.mubr.bf16.vlgmr.msra.gmra.mrb[8].mxu1 %v5637_v42  ;;  %3915 = vmatpush1.bf16.msra.mxu0 %v5012_v62  ;;  %v5033_v42 = vld [vmem:[#allocation8 + $0x68] ss:$16 sps:$4 sm:$0xff]   ;;  %v5107_v62 = vld [vmem:[#allocation8 + $0x1ec] ss:$16 sps:$4 sm:$0xff]  }
 0x20f   :  { %4087 = vmatpush1.bf16.msra.mxu1 %v5015_v63  ;;  %3916 = vmatprep.subr.bf16.mxu0 %v5020_v5  ;;  %v5102_v63 = vld [vmem:[#allocation8 + $0x1e0] ss:$16 sps:$4 sm:$0xff]   ;;  %v5105_v5 = vld [vmem:[#allocation8 + $0x1e8] ss:$16 sps:$4 sm:$0xff]  }
 0x210   :  { %4088 = vmatprep.subr.bf16.mxu1 %v5023_v0  ;;  %v5110_v0 = vld [vmem:[#allocation8 + $0x204] ss:$16 sps:$4 sm:$0xff]  }
 0x212   :  { %3917 = vmatpush1.bf16.msra.mxu0 %v5018_v1  ;;  %v5113_v1 = vld [vmem:[#allocation8 + $0x20c] ss:$16 sps:$4 sm:$0xff]  }
 0x213   :  { %4089 = vmatpush1.bf16.msra.mxu1 %v5021_v2  ;;  %3918 = vmatprep.subr.bf16.mxu0 %v5026_v6  ;;  %v5656_v2 = vld [vmem:[%s5716_s4] sm:$0xff] }
 0x214   :  { %4090 = vmatprep.subr.bf16.mxu1 %v5029_v7  ;;  %v671_v6 = vrot.slane %v5656_v2, %v5611_v45  ;;  %v679_v7 = vrot.slane %v5656_v2, %v5622_v61 }
 0x216   :  { %3919 = vmatpush1.bf16.msra.mxu0 %v5024_v8  ;;  %v675_v8 = vrot.slane %v5656_v2, %v5617_v47 }
 0x217   :  { %4091 = vmatpush1.bf16.msra.mxu1 %v5027_v9  ;;  %3920 = vmatprep.subr.bf16.mxu0 %v5032_v10  ;;  %v683_v9 = vrot.slane %v5656_v2, %v5625_v3 }
 0x218   :  { %4092 = vmatprep.subr.bf16.mxu1 %v5035_v11 }
 0x21a   :  { %3921 = vmatpush1.bf16.msra.mxu0 %v5030_v12 }
 0x21b   :  { %4093 = vmatpush1.bf16.msra.mxu1 %v5033_v42  ;;  %3922 = vmatprep.subr.bf16.mxu0 %v5038_v4 }
 0x21c   :  { %4094 = vmatprep.subr.bf16.mxu1 %v5041_v13 }
 0x21e   :  { %3923 = vmatpush1.bf16.msra.mxu0 %v5036_v14 }
 0x21f   :  { %4095 = vmatpush1.bf16.msra.mxu1 %v5039_v15  ;;  %3924 = vmatprep.subr.bf16.mxu0 %v5044_v16 }
 0x220   :  { %4096 = vmatprep.subr.bf16.mxu1 %v5047_v17 }
 0x222   :  { %3925 = vmatpush1.bf16.msra.mxu0 %v5042_v18 }
 0x223   :  { %4097 = vmatpush1.bf16.msra.mxu1 %v5045_v48  ;;  %3926 = vmatprep.subr.bf16.mxu0 %v5050_v19 }
 0x224   :  { %4098 = vmatprep.subr.bf16.mxu1 %v5053_v20 }
 0x226   :  { %3927 = vmatpush1.bf16.msra.mxu0 %v5048_v21 }
 0x227   :  { %4099 = vmatpush1.bf16.msra.mxu1 %v5051_v22  ;;  %3928 = vmatprep.subr.bf16.mxu0 %v5056_v23 }
 0x228   :  { %4100 = vmatprep.subr.bf16.mxu1 %v5059_v24 }
 0x22a   :  { %3929 = vmatpush1.bf16.msra.mxu0 %v5054_v25 }
 0x22b   :  { %4101 = vmatpush1.bf16.msra.mxu1 %v5057_v26  ;;  %3930 = vmatprep.subr.bf16.mxu0 %v5062_v27 }
 0x22c   :  { %4102 = vmatprep.subr.bf16.mxu1 %v5065_v28 }
 0x22e   :  { %3931 = vmatpush1.bf16.msra.mxu0 %v5060_v29 }
 0x22f   :  { %4103 = vmatpush1.bf16.msra.mxu1 %v5063_v30  ;;  %3932 = vmatprep.subr.bf16.mxu0 %v5068_v31 }
 0x230   :  { %4104 = vmatprep.subr.bf16.mxu1 %v5071_v32 }
 0x232   :  { %3933 = vmatpush1.bf16.msra.mxu0 %v5066_v33 }
 0x233   :  { %4105 = vmatpush1.bf16.msra.mxu1 %v5069_v34  ;;  %3934 = vmatprep.subr.bf16.mxu0 %v5074_v35  ;;  %v5108_v35 = vld [vmem:[#allocation8 + $0x200] ss:$16 sps:$4 sm:$0xff]  }
 0x234   :  { %4106 = vmatprep.subr.bf16.mxu1 %v5077_v36  ;;  %v5111_v36 = vld [vmem:[#allocation8 + $0x208] ss:$16 sps:$4 sm:$0xff]  }
 0x236   :  { %3935 = vmatpush1.bf16.msra.mxu0 %v5072_v37  ;;  %v5116_v37 = vld [vmem:[#allocation8 + $0x224] ss:$16 sps:$4 sm:$0xff]  }
 0x237   :  { %4107 = vmatpush1.bf16.msra.mxu1 %v5075_v38  ;;  %3936 = vmatprep.subr.bf16.mxu0 %v5080_v39  ;;  %v5119_v38 = vld [vmem:[#allocation8 + $0x22c] ss:$16 sps:$4 sm:$0xff]   ;;  %v5114_v39 = vld [vmem:[#allocation8 + $0x220] ss:$16 sps:$4 sm:$0xff]  }
 0x238   :  { %4108 = vmatprep.subr.bf16.mxu1 %v5083_v40  ;;  %v5117_v40 = vld [vmem:[#allocation8 + $0x228] ss:$16 sps:$4 sm:$0xff]  }
 0x23a   :  { %3937 = vmatpush1.bf16.msra.mxu0 %v5078_v41  ;;  %v5122_v41 = vld [vmem:[#allocation8 + $0x244] ss:$16 sps:$4 sm:$0xff]  }
 0x23b   :  { %4109 = vmatpush1.bf16.msra.mxu1 %v5081_v43  ;;  %3938 = vmatprep.subr.bf16.mxu0 %v5086_v46  ;;  %v5125_v43 = vld [vmem:[#allocation8 + $0x24c] ss:$16 sps:$4 sm:$0xff]   ;;  %v5120_v46 = vld [vmem:[#allocation8 + $0x240] ss:$16 sps:$4 sm:$0xff]  }
 0x23c   :  { %4110 = vmatprep.subr.bf16.mxu1 %v5089_v49  ;;  %v5123_v49 = vld [vmem:[#allocation8 + $0x248] ss:$16 sps:$4 sm:$0xff]  }
 0x23e   :  { %3939 = vmatpush1.bf16.msra.mxu0 %v5084_v50  ;;  %v5128_v50 = vld [vmem:[#allocation8 + $0x264] ss:$16 sps:$4 sm:$0xff]  }
 0x23f   :  { %4111 = vmatpush1.bf16.msra.mxu1 %v5087_v51  ;;  %3940 = vmatprep.subr.bf16.mxu0 %v5092_v52  ;;  %v5131_v51 = vld [vmem:[#allocation8 + $0x26c] ss:$16 sps:$4 sm:$0xff]   ;;  %v5126_v52 = vld [vmem:[#allocation8 + $0x260] ss:$16 sps:$4 sm:$0xff]  }
 0x240   :  { %4112 = vmatprep.subr.bf16.mxu1 %v5095_v53  ;;  %v5129_v53 = vld [vmem:[#allocation8 + $0x268] ss:$16 sps:$4 sm:$0xff]  }
 0x242   :  { %3941 = vmatpush1.bf16.msra.mxu0 %v5090_v54  ;;  %v5134_v54 = vld [vmem:[#allocation8 + $0x284] ss:$16 sps:$4 sm:$0xff]  }
 0x243   :  { %4113 = vmatpush1.bf16.msra.mxu1 %v5093_v55  ;;  %3942 = vmatprep.subr.bf16.mxu0 %v5098_v56  ;;  %v5137_v55 = vld [vmem:[#allocation8 + $0x28c] ss:$16 sps:$4 sm:$0xff]   ;;  %v5132_v56 = vld [vmem:[#allocation8 + $0x280] ss:$16 sps:$4 sm:$0xff]  }
 0x244   :  { %4114 = vmatprep.subr.bf16.mxu1 %v5101_v57  ;;  %v5135_v57 = vld [vmem:[#allocation8 + $0x288] ss:$16 sps:$4 sm:$0xff]  }
 0x246   :  { %3943 = vmatpush1.bf16.msra.mxu0 %v5096_v58  ;;  %v5140_v58 = vld [vmem:[#allocation8 + $0x2a4] ss:$16 sps:$4 sm:$0xff]  }
 0x247   :  { %4115 = vmatpush1.bf16.msra.mxu1 %v5099_v59  ;;  %3944 = vmatprep.subr.bf16.mxu0 %v5104_v60  ;;  %v5143_v59 = vld [vmem:[#allocation8 + $0x2ac] ss:$16 sps:$4 sm:$0xff]   ;;  %v5138_v60 = vld [vmem:[#allocation8 + $0x2a0] ss:$16 sps:$4 sm:$0xff]  }
 0x248   :  { %4116 = vmatprep.subr.bf16.mxu1 %v5107_v62  ;;  %v5141_v62 = vld [vmem:[#allocation8 + $0x2a8] ss:$16 sps:$4 sm:$0xff]  }
 0x24a   :  { %3945 = vmatpush1.bf16.msra.mxu0 %v5102_v63  ;;  %v5146_v63 = vld [vmem:[#allocation8 + $0x2c4] ss:$16 sps:$4 sm:$0xff]  }
 0x24b   :  { %4117 = vmatpush1.bf16.msra.mxu1 %v5105_v5  ;;  %3957 = vmatprep.subr.bf16.mxu0 %v5110_v0  ;;  %v5149_v5 = vld [vmem:[#allocation8 + $0x2cc] ss:$16 sps:$4 sm:$0xff]   ;;  %v5144_v0 = vld [vmem:[#allocation8 + $0x2c0] ss:$16 sps:$4 sm:$0xff]  }
 0x24c   :  { %4129 = vmatprep.subr.bf16.mxu1 %v5113_v1  ;;  %v5147_v1 = vld [vmem:[#allocation8 + $0x2c8] ss:$16 sps:$4 sm:$0xff]  }
 0x260   :  { %v2065_v10 = vpop.f32.mrb[4].mxu0  ;;  %v2151_v11 = vpop.f32.mrb[4].mxu1 }
 0x261   :  { %v4888_v12 = vadd.f32 %v2065_v10, %v671_v6  ;;  %v4892_v42 = vadd.f32 %v2151_v11, %v679_v7  ;;  %v2067_v4 = vpop.f32.mrb[5].mxu0  ;;  %v2153_v13 = vpop.f32.mrb[5].mxu1  ;;  %v5158_v10 = vld [vmem:[#allocation8 + $0x304] ss:$16 sps:$4 sm:$0xff]   ;;  %v5161_v11 = vld [vmem:[#allocation8 + $0x30c] ss:$16 sps:$4 sm:$0xff]  }
 0x262   :  { %v4889_v14 = vadd.f32 %v2067_v4, %v675_v8  ;;  %v4893_v15 = vadd.f32 %v2153_v13, %v683_v9  ;;  %v2069_v16 = vpop.f32.mrb[6].mxu0  ;;  %v2155_v17 = vpop.f32.mrb[6].mxu1  ;;  %v5164_v4 = vld [vmem:[#allocation8 + $0x324] ss:$16 sps:$4 sm:$0xff]   ;;  %v5167_v13 = vld [vmem:[#allocation8 + $0x32c] ss:$16 sps:$4 sm:$0xff]  }
 0x263   :  { %v4890_v18 = vadd.f32 %v2069_v16, %v671_v6  ;;  %v4894_v48 = vadd.f32 %v2155_v17, %v679_v7  ;;  %v2071_v19 = vpop.f32.mrb[7].mxu0  ;;  %v2157_v20 = vpop.f32.mrb[7].mxu1  ;;  %v2332_v23 = vmax.f32 %v4888_v12, 0.0  ;;  %v2334_v24 = vmax.f32 %v4892_v42, 0.0  ;;  %v5152_v6 = vld [vmem:[#allocation8 + $0x2e4] ss:$16 sps:$4 sm:$0xff]  }
 0x264   :  { %v4891_v21 = vadd.f32 %v2071_v19, %v675_v8  ;;  %v4895_v22 = vadd.f32 %v2157_v20, %v683_v9  ;;  %v2333_v27 = vmax.f32 %v4889_v14, 0.0  ;;  %v2335_v28 = vmax.f32 %v4893_v15, 0.0  ;;  %v5155_v7 = vld [vmem:[#allocation8 + $0x2ec] ss:$16 sps:$4 sm:$0xff]   ;;  %v5150_v8 = vld [vmem:[#allocation8 + $0x2e0] ss:$16 sps:$4 sm:$0xff]  }
 0x265   :  { %v2340_v25 = vmax.f32 %v4890_v18, 0.0  ;;  %v2342_v26 = vmax.f32 %v4894_v48, 0.0  ;;  %v5153_v9 = vld [vmem:[#allocation8 + $0x2e8] ss:$16 sps:$4 sm:$0xff]   ;;  %v5156_v12 = vld [vmem:[#allocation8 + $0x300] ss:$16 sps:$4 sm:$0xff]  }
 0x266   :  { %v2341_v29 = vmax.f32 %v4891_v21, 0.0  ;;  %v2343_v30 = vmax.f32 %v4895_v22, 0.0  ;;  %v5159_v42 = vld [vmem:[#allocation8 + $0x308] ss:$16 sps:$4 sm:$0xff]   ;;  %v5162_v14 = vld [vmem:[#allocation8 + $0x320] ss:$16 sps:$4 sm:$0xff]  }
 0x267   :  { %v2348_v31 = vpack.c.bf16 %v2340_v25, %v2332_v23  ;;  %v5666_v32 = vpack.c.bf16 %v2342_v26, %v2334_v24  ;;  %v5165_v15 = vld [vmem:[#allocation8 + $0x328] ss:$16 sps:$4 sm:$0xff]   ;;  %v5170_v16 = vld [vmem:[#allocation8 + $0x344] ss:$16 sps:$4 sm:$0xff]   ;;  %v5173_v17 = vld [vmem:[#allocation8 + $0x34c] ss:$16 sps:$4 sm:$0xff]  }
 0x268   :  { %v2349_v33 = vpack.c.bf16 %v2341_v29, %v2333_v27  ;;  %v2351_v34 = vpack.c.bf16 %v2343_v30, %v2335_v28  ;;  %v5168_v18 = vld [vmem:[#allocation8 + $0x340] ss:$16 sps:$4 sm:$0xff]   ;;  %v5171_v48 = vld [vmem:[#allocation8 + $0x348] ss:$16 sps:$4 sm:$0xff]   ;;  %v5176_v19 = vld [vmem:[#allocation8 + $0x364] ss:$16 sps:$4 sm:$0xff]  }
 0x269   :  { %v5179_v20 = vld [vmem:[#allocation8 + $0x36c] ss:$16 sps:$4 sm:$0xff]   ;;  %v5174_v21 = vld [vmem:[#allocation8 + $0x360] ss:$16 sps:$4 sm:$0xff]   ;;  %v5177_v22 = vld [vmem:[#allocation8 + $0x368] ss:$16 sps:$4 sm:$0xff]  }
 0x26a   :  { %3946 = vmatprep.mubr.bf16.mxu0 %v2349_v33  ;;  %4118 = vmatprep.mubr.bf16.mxu1 %v2349_v33  ;;  %v5182_v23 = vld [vmem:[#allocation8 + $0x384] ss:$16 sps:$4 sm:$0xff]   ;;  %v5185_v24 = vld [vmem:[#allocation8 + $0x38c] ss:$16 sps:$4 sm:$0xff]   ;;  %v5180_v25 = vld [vmem:[#allocation8 + $0x380] ss:$16 sps:$4 sm:$0xff]  }
 0x26b   :  { %3947 = vmatmul.mubr.bf16.vlgmr.msra.gmra.mrb[12].mxu0 %v2348_v31  ;;  %4119 = vmatmul.mubr.bf16.vlgmr.msra.gmra.mrb[12].mxu1 %v2348_v31  ;;  %v5183_v26 = vld [vmem:[#allocation8 + $0x388] ss:$16 sps:$4 sm:$0xff]   ;;  %v5188_v27 = vld [vmem:[#allocation8 + $0x3a4] ss:$16 sps:$4 sm:$0xff]   ;;  %v5191_v28 = vld [vmem:[#allocation8 + $0x3ac] ss:$16 sps:$4 sm:$0xff]  }
 0x26c   :  { %3958 = vmatpush1.bf16.msra.mxu0 %v5108_v35  ;;  %4130 = vmatpush1.bf16.msra.mxu1 %v5111_v36  ;;  %v5186_v29 = vld [vmem:[#allocation8 + $0x3a0] ss:$16 sps:$4 sm:$0xff]   ;;  %v5189_v30 = vld [vmem:[#allocation8 + $0x3a8] ss:$16 sps:$4 sm:$0xff]   ;;  %v5194_v31 = vld [vmem:[#allocation8 + $0x3c4] ss:$16 sps:$4 sm:$0xff]  }
 0x26d   :  { %3989 = vmatprep.mubr.bf16.mxu0 %v2351_v34  ;;  %4161 = vmatprep.mubr.bf16.mxu1 %v2351_v34  ;;  %v5197_v33 = vld [vmem:[#allocation8 + $0x3cc] ss:$16 sps:$4 sm:$0xff]   ;;  %v5192_v34 = vld [vmem:[#allocation8 + $0x3c0] ss:$16 sps:$4 sm:$0xff]   ;;  %v5195_v35 = vld [vmem:[#allocation8 + $0x3c8] ss:$16 sps:$4 sm:$0xff]  }
 0x26e   :  { %3959 = vmatprep.subr.bf16.mxu0 %v5116_v37  ;;  %4131 = vmatprep.subr.bf16.mxu1 %v5119_v38  ;;  %v5200_v36 = vld [vmem:[#allocation8 + $0x3e4] ss:$16 sps:$4 sm:$0xff]   ;;  %v5203_v37 = vld [vmem:[#allocation8 + $0x3ec] ss:$16 sps:$4 sm:$0xff]   ;;  %v5198_v38 = vld [vmem:[#allocation8 + $0x3e0] ss:$16 sps:$4 sm:$0xff]  }
 0x270   :  { %3960 = vmatpush1.bf16.msra.mxu0 %v5114_v39  ;;  %4132 = vmatpush1.bf16.msra.mxu1 %v5117_v40  ;;  %v5201_v39 = vld [vmem:[#allocation8 + $0x3e8] ss:$16 sps:$4 sm:$0xff]   ;;  %v5206_v40 = vld [vmem:[#allocation8 + $0x404] ss:$16 sps:$4 sm:$0xff]  }
 0x271   :  { %3961 = vmatprep.subr.bf16.mxu0 %v5122_v41  ;;  %4133 = vmatprep.subr.bf16.mxu1 %v5125_v43  ;;  %v5209_v41 = vld [vmem:[#allocation8 + $0x40c] ss:$16 sps:$4 sm:$0xff]   ;;  %v5204_v43 = vld [vmem:[#allocation8 + $0x400] ss:$16 sps:$4 sm:$0xff]  }
 0x274   :  { %3962 = vmatpush1.bf16.msra.mxu0 %v5120_v46  ;;  %4134 = vmatpush1.bf16.msra.mxu1 %v5123_v49  ;;  %v5207_v46 = vld [vmem:[#allocation8 + $0x408] ss:$16 sps:$4 sm:$0xff]   ;;  %v5212_v49 = vld [vmem:[#allocation8 + $0x424] ss:$16 sps:$4 sm:$0xff]  }
 0x275   :  { %3963 = vmatprep.subr.bf16.mxu0 %v5128_v50  ;;  %4135 = vmatprep.subr.bf16.mxu1 %v5131_v51  ;;  %v5215_v50 = vld [vmem:[#allocation8 + $0x42c] ss:$16 sps:$4 sm:$0xff]   ;;  %v5210_v51 = vld [vmem:[#allocation8 + $0x420] ss:$16 sps:$4 sm:$0xff]  }
 0x278   :  { %3964 = vmatpush1.bf16.msra.mxu0 %v5126_v52  ;;  %4136 = vmatpush1.bf16.msra.mxu1 %v5129_v53  ;;  %v5213_v52 = vld [vmem:[#allocation8 + $0x428] ss:$16 sps:$4 sm:$0xff]   ;;  %v5218_v53 = vld [vmem:[#allocation8 + $0x444] ss:$16 sps:$4 sm:$0xff]  }
 0x279   :  { %3965 = vmatprep.subr.bf16.mxu0 %v5134_v54  ;;  %4137 = vmatprep.subr.bf16.mxu1 %v5137_v55  ;;  %v5221_v54 = vld [vmem:[#allocation8 + $0x44c] ss:$16 sps:$4 sm:$0xff]   ;;  %v5216_v55 = vld [vmem:[#allocation8 + $0x440] ss:$16 sps:$4 sm:$0xff]  }
 0x27c   :  { %3966 = vmatpush1.bf16.msra.mxu0 %v5132_v56  ;;  %4138 = vmatpush1.bf16.msra.mxu1 %v5135_v57  ;;  %v5219_v56 = vld [vmem:[#allocation8 + $0x448] ss:$16 sps:$4 sm:$0xff]   ;;  %v5224_v57 = vld [vmem:[#allocation8 + $0x464] ss:$16 sps:$4 sm:$0xff]  }
 0x27d   :  { %3967 = vmatprep.subr.bf16.mxu0 %v5140_v58  ;;  %4139 = vmatprep.subr.bf16.mxu1 %v5143_v59  ;;  %v5227_v58 = vld [vmem:[#allocation8 + $0x46c] ss:$16 sps:$4 sm:$0xff]   ;;  %v5222_v59 = vld [vmem:[#allocation8 + $0x460] ss:$16 sps:$4 sm:$0xff]  }
 0x280   :  { %3968 = vmatpush1.bf16.msra.mxu0 %v5138_v60  ;;  %4140 = vmatpush1.bf16.msra.mxu1 %v5141_v62  ;;  %v5230_v60 = vld [vmem:[#allocation8 + $0x484] ss:$16 sps:$4 sm:$0xff]   ;;  %v5233_v62 = vld [vmem:[#allocation8 + $0x48c] ss:$16 sps:$4 sm:$0xff]  }
 0x281   :  { %3969 = vmatprep.subr.bf16.mxu0 %v5146_v63  ;;  %4141 = vmatprep.subr.bf16.mxu1 %v5149_v5  ;;  %v5228_v63 = vld [vmem:[#allocation8 + $0x480] ss:$16 sps:$4 sm:$0xff]   ;;  %v5231_v5 = vld [vmem:[#allocation8 + $0x488] ss:$16 sps:$4 sm:$0xff]  }
 0x284   :  { %3970 = vmatpush1.bf16.msra.mxu0 %v5144_v0  ;;  %4142 = vmatpush1.bf16.msra.mxu1 %v5147_v1  ;;  %v5236_v0 = vld [vmem:[#allocation8 + $0x4a4] ss:$16 sps:$4 sm:$0xff]   ;;  %v5239_v1 = vld [vmem:[#allocation8 + $0x4ac] ss:$16 sps:$4 sm:$0xff]  }
 0x285   :  { %3971 = vmatprep.subr.bf16.mxu0 %v5152_v6  ;;  %4143 = vmatprep.subr.bf16.mxu1 %v5155_v7  ;;  %v5234_v6 = vld [vmem:[#allocation8 + $0x4a0] ss:$16 sps:$4 sm:$0xff]   ;;  %v5237_v7 = vld [vmem:[#allocation8 + $0x4a8] ss:$16 sps:$4 sm:$0xff]  }
 0x288   :  { %3972 = vmatpush1.bf16.msra.mxu0 %v5150_v8  ;;  %4144 = vmatpush1.bf16.msra.mxu1 %v5153_v9  ;;  %v5242_v8 = vld [vmem:[#allocation8 + $0x4c4] ss:$16 sps:$4 sm:$0xff]   ;;  %v5245_v9 = vld [vmem:[#allocation8 + $0x4cc] ss:$16 sps:$4 sm:$0xff]  }
 0x289   :  { %3973 = vmatprep.subr.bf16.mxu0 %v5158_v10  ;;  %4145 = vmatprep.subr.bf16.mxu1 %v5161_v11  ;;  %v5240_v10 = vld [vmem:[#allocation8 + $0x4c0] ss:$16 sps:$4 sm:$0xff]   ;;  %v5243_v11 = vld [vmem:[#allocation8 + $0x4c8] ss:$16 sps:$4 sm:$0xff]  }
 0x28c   :  { %3974 = vmatpush1.bf16.msra.mxu0 %v5156_v12  ;;  %4146 = vmatpush1.bf16.msra.mxu1 %v5159_v42  ;;  %v5248_v12 = vld [vmem:[#allocation8 + $0x4e4] ss:$16 sps:$4 sm:$0xff]   ;;  %v5251_v42 = vld [vmem:[#allocation8 + $0x4ec] ss:$16 sps:$4 sm:$0xff]  }
 0x28d   :  { %3975 = vmatprep.subr.bf16.mxu0 %v5164_v4  ;;  %4147 = vmatprep.subr.bf16.mxu1 %v5167_v13  ;;  %v5246_v4 = vld [vmem:[#allocation8 + $0x4e0] ss:$16 sps:$4 sm:$0xff]   ;;  %v5249_v13 = vld [vmem:[#allocation8 + $0x4e8] ss:$16 sps:$4 sm:$0xff]  }
 0x290   :  { %3976 = vmatpush1.bf16.msra.mxu0 %v5162_v14  ;;  %4148 = vmatpush1.bf16.msra.mxu1 %v5165_v15  ;;  %v5254_v14 = vld [vmem:[#allocation8 + $0x504] ss:$16 sps:$4 sm:$0xff]   ;;  %v5257_v15 = vld [vmem:[#allocation8 + $0x50c] ss:$16 sps:$4 sm:$0xff]  }
 0x291   :  { %3977 = vmatprep.subr.bf16.mxu0 %v5170_v16  ;;  %4149 = vmatprep.subr.bf16.mxu1 %v5173_v17  ;;  %v5252_v16 = vld [vmem:[#allocation8 + $0x500] ss:$16 sps:$4 sm:$0xff]   ;;  %v5255_v17 = vld [vmem:[#allocation8 + $0x508] ss:$16 sps:$4 sm:$0xff]  }
 0x294   :  { %3978 = vmatpush1.bf16.msra.mxu0 %v5168_v18  ;;  %4150 = vmatpush1.bf16.msra.mxu1 %v5171_v48  ;;  %v5260_v18 = vld [vmem:[#allocation8 + $0x524] ss:$16 sps:$4 sm:$0xff]   ;;  %v5263_v48 = vld [vmem:[#allocation8 + $0x52c] ss:$16 sps:$4 sm:$0xff]  }
 0x295   :  { %3979 = vmatprep.subr.bf16.mxu0 %v5176_v19  ;;  %4151 = vmatprep.subr.bf16.mxu1 %v5179_v20  ;;  %v5258_v19 = vld [vmem:[#allocation8 + $0x520] ss:$16 sps:$4 sm:$0xff]   ;;  %v5261_v20 = vld [vmem:[#allocation8 + $0x528] ss:$16 sps:$4 sm:$0xff]  }
 0x298   :  { %3980 = vmatpush1.bf16.msra.mxu0 %v5174_v21  ;;  %4152 = vmatpush1.bf16.msra.mxu1 %v5177_v22  ;;  %v5266_v21 = vld [vmem:[#allocation8 + $0x544] ss:$16 sps:$4 sm:$0xff]   ;;  %v5269_v22 = vld [vmem:[#allocation8 + $0x54c] ss:$16 sps:$4 sm:$0xff]  }
 0x299   :  { %3981 = vmatprep.subr.bf16.mxu0 %v5182_v23  ;;  %4153 = vmatprep.subr.bf16.mxu1 %v5185_v24  ;;  %v5264_v23 = vld [vmem:[#allocation8 + $0x540] ss:$16 sps:$4 sm:$0xff]   ;;  %v5267_v24 = vld [vmem:[#allocation8 + $0x548] ss:$16 sps:$4 sm:$0xff]  }
 0x29c   :  { %3982 = vmatpush1.bf16.msra.mxu0 %v5180_v25  ;;  %4154 = vmatpush1.bf16.msra.mxu1 %v5183_v26  ;;  %v5272_v25 = vld [vmem:[#allocation8 + $0x564] ss:$16 sps:$4 sm:$0xff]   ;;  %v5275_v26 = vld [vmem:[#allocation8 + $0x56c] ss:$16 sps:$4 sm:$0xff]  }
 0x29d   :  { %3983 = vmatprep.subr.bf16.mxu0 %v5188_v27  ;;  %4155 = vmatprep.subr.bf16.mxu1 %v5191_v28  ;;  %v5270_v27 = vld [vmem:[#allocation8 + $0x560] ss:$16 sps:$4 sm:$0xff]   ;;  %v5273_v28 = vld [vmem:[#allocation8 + $0x568] ss:$16 sps:$4 sm:$0xff]  }
 0x2a0   :  { %3984 = vmatpush1.bf16.msra.mxu0 %v5186_v29  ;;  %4156 = vmatpush1.bf16.msra.mxu1 %v5189_v30  ;;  %v5278_v29 = vld [vmem:[#allocation8 + $0x584] ss:$16 sps:$4 sm:$0xff]   ;;  %v5281_v30 = vld [vmem:[#allocation8 + $0x58c] ss:$16 sps:$4 sm:$0xff]  }
 0x2a1   :  { %3985 = vmatprep.subr.bf16.mxu0 %v5194_v31  ;;  %4157 = vmatprep.subr.bf16.mxu1 %v5197_v33  ;;  %v5276_v31 = vld [vmem:[#allocation8 + $0x580] ss:$16 sps:$4 sm:$0xff]   ;;  %v5279_v33 = vld [vmem:[#allocation8 + $0x588] ss:$16 sps:$4 sm:$0xff]  }
 0x2a4   :  { %3986 = vmatpush1.bf16.msra.mxu0 %v5192_v34  ;;  %4158 = vmatpush1.bf16.msra.mxu1 %v5195_v35  ;;  %v5284_v34 = vld [vmem:[#allocation8 + $0x5a4] ss:$16 sps:$4 sm:$0xff]   ;;  %v5287_v35 = vld [vmem:[#allocation8 + $0x5ac] ss:$16 sps:$4 sm:$0xff]  }
 0x2a5   :  { %3987 = vmatprep.subr.bf16.mxu0 %v5200_v36  ;;  %4159 = vmatprep.subr.bf16.mxu1 %v5203_v37  ;;  %v686_v36 = vsub.s32 4, %v5608_v44  ;;  %v694_v37 = vsub.s32 6, %v5608_v44 }
 0x2a8   :  { %3988 = vmatpush1.bf16.msra.mxu0 %v5198_v38  ;;  %4160 = vmatpush1.bf16.msra.mxu1 %v5201_v39  ;;  %v690_v38 = vsub.s32 5, %v5608_v44  ;;  %v698_v39 = vsub.s32 7, %v5608_v44 }
 0x2a9   :  { %4000 = vmatprep.subr.bf16.mxu0 %v5206_v40  ;;  %4172 = vmatprep.subr.bf16.mxu1 %v5209_v41  ;;  %v5282_v40 = vld [vmem:[#allocation8 + $0x5a0] ss:$16 sps:$4 sm:$0xff]   ;;  %v5285_v41 = vld [vmem:[#allocation8 + $0x5a8] ss:$16 sps:$4 sm:$0xff]  }
 0x2ab   :  { %3990 = vmatmul.mubr.bf16.vlgmr.msra.gmra.mrb[12].mxu0 %v5666_v32  ;;  %4162 = vmatmul.mubr.bf16.vlgmr.msra.gmra.mrb[12].mxu1 %v5666_v32  ;;  %v5225_v32 = vld [vmem:[#allocation8 + $0x468] ss:$16 sps:$4 sm:$0xff]  }
 0x2ac   :  { %4001 = vmatpush1.bf16.msra.mxu0 %v5204_v43  ;;  %4173 = vmatpush1.bf16.msra.mxu1 %v5207_v46  ;;  %v687_v43 = vrot.slane %v5656_v2, %v686_v36  ;;  %v5290_v46 = vld [vmem:[#allocation8 + $0x5c4] ss:$16 sps:$4 sm:$0xff]  }
 0x2ad   :  { %4002 = vmatprep.subr.bf16.mxu0 %v5212_v49  ;;  %4174 = vmatprep.subr.bf16.mxu1 %v5215_v50  ;;  %v5293_v49 = vld [vmem:[#allocation8 + $0x5cc] ss:$16 sps:$4 sm:$0xff]   ;;  %v695_v50 = vrot.slane %v5656_v2, %v694_v37 }
 0x2b0   :  { %4003 = vmatpush1.bf16.msra.mxu0 %v5210_v51  ;;  %4175 = vmatpush1.bf16.msra.mxu1 %v5213_v52  ;;  %v691_v51 = vrot.slane %v5656_v2, %v690_v38  ;;  %v699_v52 = vrot.slane %v5656_v2, %v698_v39  ;;  %v5323_v38 = vld [vmem:[#allocation8 + $0x66c] ss:$16 sps:$4 sm:$0xff]   ;;  %v5318_v39 = vld [vmem:[#allocation8 + $0x660] ss:$16 sps:$4 sm:$0xff]  }
 0x2b1   :  { %4004 = vmatprep.subr.bf16.mxu0 %v5218_v53  ;;  %4176 = vmatprep.subr.bf16.mxu1 %v5221_v54  ;;  %v5288_v54 = vld [vmem:[#allocation8 + $0x5c0] ss:$16 sps:$4 sm:$0xff]  }
 0x2b4   :  { %4005 = vmatpush1.bf16.msra.mxu0 %v5216_v55  ;;  %4177 = vmatpush1.bf16.msra.mxu1 %v5219_v56  ;;  %v5291_v55 = vld [vmem:[#allocation8 + $0x5c8] ss:$16 sps:$4 sm:$0xff]  }
 0x2b5   :  { %4006 = vmatprep.subr.bf16.mxu0 %v5224_v57  ;;  %4178 = vmatprep.subr.bf16.mxu1 %v5227_v58 }
 0x2b8   :  { %4007 = vmatpush1.bf16.msra.mxu0 %v5222_v59  ;;  %4179 = vmatpush1.bf16.msra.mxu1 %v5225_v32  ;;  %v5296_v59 = vld [vmem:[#allocation8 + $0x5e4] ss:$16 sps:$4 sm:$0xff]   ;;  %v5299_v32 = vld [vmem:[#allocation8 + $0x5ec] ss:$16 sps:$4 sm:$0xff]  }
 0x2b9   :  { %4008 = vmatprep.subr.bf16.mxu0 %v5230_v60  ;;  %4180 = vmatprep.subr.bf16.mxu1 %v5233_v62 }
 0x2bc   :  { %4009 = vmatpush1.bf16.msra.mxu0 %v5228_v63  ;;  %4181 = vmatpush1.bf16.msra.mxu1 %v5231_v5 }
 0x2bd   :  { %4010 = vmatprep.subr.bf16.mxu0 %v5236_v0  ;;  %4182 = vmatprep.subr.bf16.mxu1 %v5239_v1 }
 0x2c0   :  { %4011 = vmatpush1.bf16.msra.mxu0 %v5234_v6  ;;  %4183 = vmatpush1.bf16.msra.mxu1 %v5237_v7 }
 0x2c1   :  { %4012 = vmatprep.subr.bf16.mxu0 %v5242_v8  ;;  %4184 = vmatprep.subr.bf16.mxu1 %v5245_v9 }
 0x2c4   :  { %4013 = vmatpush1.bf16.msra.mxu0 %v5240_v10  ;;  %4185 = vmatpush1.bf16.msra.mxu1 %v5243_v11  ;;  %v5294_v10 = vld [vmem:[#allocation8 + $0x5e0] ss:$16 sps:$4 sm:$0xff]   ;;  %v5297_v11 = vld [vmem:[#allocation8 + $0x5e8] ss:$16 sps:$4 sm:$0xff]  }
 0x2c5   :  { %4014 = vmatprep.subr.bf16.mxu0 %v5248_v12  ;;  %4186 = vmatprep.subr.bf16.mxu1 %v5251_v42 }
 0x2c8   :  { %4015 = vmatpush1.bf16.msra.mxu0 %v5246_v4  ;;  %4187 = vmatpush1.bf16.msra.mxu1 %v5249_v13  ;;  %v5302_v13 = vld [vmem:[#allocation8 + $0x604] ss:$16 sps:$4 sm:$0xff]  }
 0x2c9   :  { %4016 = vmatprep.subr.bf16.mxu0 %v5254_v14  ;;  %4188 = vmatprep.subr.bf16.mxu1 %v5257_v15  ;;  %v5305_v14 = vld [vmem:[#allocation8 + $0x60c] ss:$16 sps:$4 sm:$0xff]  }
 0x2cc   :  { %4017 = vmatpush1.bf16.msra.mxu0 %v5252_v16  ;;  %4189 = vmatpush1.bf16.msra.mxu1 %v5255_v17 }
 0x2cd   :  { %4018 = vmatprep.subr.bf16.mxu0 %v5260_v18  ;;  %4190 = vmatprep.subr.bf16.mxu1 %v5263_v48 }
 0x2d0   :  { %4019 = vmatpush1.bf16.msra.mxu0 %v5258_v19  ;;  %4191 = vmatpush1.bf16.msra.mxu1 %v5261_v20 }
 0x2d1   :  { %4020 = vmatprep.subr.bf16.mxu0 %v5266_v21  ;;  %4192 = vmatprep.subr.bf16.mxu1 %v5269_v22 }
 0x2d4   :  { %4021 = vmatpush1.bf16.msra.mxu0 %v5264_v23  ;;  %4193 = vmatpush1.bf16.msra.mxu1 %v5267_v24  ;;  %v5300_v23 = vld [vmem:[#allocation8 + $0x600] ss:$16 sps:$4 sm:$0xff]   ;;  %v5303_v24 = vld [vmem:[#allocation8 + $0x608] ss:$16 sps:$4 sm:$0xff]  }
 0x2d5   :  { %4022 = vmatprep.subr.bf16.mxu0 %v5272_v25  ;;  %4194 = vmatprep.subr.bf16.mxu1 %v5275_v26  ;;  %v5308_v26 = vld [vmem:[#allocation8 + $0x624] ss:$16 sps:$4 sm:$0xff]  }
 0x2d8   :  { %4023 = vmatpush1.bf16.msra.mxu0 %v5270_v27  ;;  %4195 = vmatpush1.bf16.msra.mxu1 %v5273_v28  ;;  %v5311_v27 = vld [vmem:[#allocation8 + $0x62c] ss:$16 sps:$4 sm:$0xff]   ;;  %v5306_v28 = vld [vmem:[#allocation8 + $0x620] ss:$16 sps:$4 sm:$0xff]  }
 0x2d9   :  { %4024 = vmatprep.subr.bf16.mxu0 %v5278_v29  ;;  %4196 = vmatprep.subr.bf16.mxu1 %v5281_v30  ;;  %v5309_v29 = vld [vmem:[#allocation8 + $0x628] ss:$16 sps:$4 sm:$0xff]   ;;  %v5314_v30 = vld [vmem:[#allocation8 + $0x644] ss:$16 sps:$4 sm:$0xff]  }
 0x2dc   :  { %4025 = vmatpush1.bf16.msra.mxu0 %v5276_v31  ;;  %4197 = vmatpush1.bf16.msra.mxu1 %v5279_v33  ;;  %v5317_v31 = vld [vmem:[#allocation8 + $0x64c] ss:$16 sps:$4 sm:$0xff]   ;;  %v5312_v33 = vld [vmem:[#allocation8 + $0x640] ss:$16 sps:$4 sm:$0xff]  }
 0x2dd   :  { %4026 = vmatprep.subr.bf16.mxu0 %v5284_v34  ;;  %4198 = vmatprep.subr.bf16.mxu1 %v5287_v35  ;;  %v5315_v34 = vld [vmem:[#allocation8 + $0x648] ss:$16 sps:$4 sm:$0xff]   ;;  %v5320_v35 = vld [vmem:[#allocation8 + $0x664] ss:$16 sps:$4 sm:$0xff]  }
 0x2e0   :  { %4027 = vmatpush1.bf16.msra.mxu0 %v5282_v40  ;;  %4199 = vmatpush1.bf16.msra.mxu1 %v5285_v41  ;;  %v2237_v53 = vpop.f32.mrb[8].mxu0  ;;  %v5321_v40 = vld [vmem:[#allocation8 + $0x668] ss:$16 sps:$4 sm:$0xff]   ;;  %v5326_v41 = vld [vmem:[#allocation8 + $0x684] ss:$16 sps:$4 sm:$0xff]  }
 0x2e1   :  { %v4896_v56 = vadd.f32 %v2237_v53, %v687_v43  ;;  %v2323_v57 = vpop.f32.mrb[8].mxu1  ;;  %v2239_v58 = vpop.f32.mrb[9].mxu0  ;;  %4028 = vmatprep.subr.bf16.mxu0 %v5290_v46  ;;  %4200 = vmatprep.subr.bf16.mxu1 %v5293_v49  ;;  %v5324_v46 = vld [vmem:[#allocation8 + $0x680] ss:$16 sps:$4 sm:$0xff]   ;;  %v5327_v49 = vld [vmem:[#allocation8 + $0x688] ss:$16 sps:$4 sm:$0xff]  }
 0x2e2   :  { %v4900_v60 = vadd.f32 %v2323_v57, %v695_v50  ;;  %v4897_v62 = vadd.f32 %v2239_v58, %v691_v51  ;;  %v2325_v63 = vpop.f32.mrb[9].mxu1  ;;  %v2241_v5 = vpop.f32.mrb[10].mxu0  ;;  %v5333_v53 = vld [vmem:[#allocation8 + $0x6a8] ss:$16 sps:$4 sm:$0xff]   ;;  %v5344_v58 = vld [vmem:[#allocation8 + $0x6e4] ss:$16 sps:$4 sm:$0xff]  }
 0x2e3   :  { %v4901_v0 = vadd.f32 %v2325_v63, %v699_v52  ;;  %v4898_v1 = vadd.f32 %v2241_v5, %v687_v43  ;;  %v2327_v6 = vpop.f32.mrb[10].mxu1  ;;  %v2243_v2 = vpop.f32.mrb[11].mxu0  ;;  %v2336_v12 = vmax.f32 %v4896_v56, 0.0  ;;  %v5329_v43 = vld [vmem:[#allocation8 + $0x68c] ss:$16 sps:$4 sm:$0xff]  }
 0x2e4   :  { %v4902_v7 = vadd.f32 %v2327_v6, %v695_v50  ;;  %v4899_v8 = vadd.f32 %v2243_v2, %v691_v51  ;;  %v2329_v9 = vpop.f32.mrb[11].mxu1  ;;  %4029 = vmatpush1.bf16.msra.mxu0 %v5288_v54  ;;  %4201 = vmatpush1.bf16.msra.mxu1 %v5291_v55  ;;  %v2338_v15 = vmax.f32 %v4900_v60, 0.0  ;;  %v2337_v16 = vmax.f32 %v4897_v62, 0.0  ;;  %v5332_v50 = vld [vmem:[#allocation8 + $0x6a4] ss:$16 sps:$4 sm:$0xff]  }
 0x2e5   :  { %v2344_v42 = vmax.f32 %v4898_v1, 0.0  ;;  %v4903_v4 = vadd.f32 %v2329_v9, %v699_v52  ;;  %4030 = vmatprep.subr.bf16.mxu0 %v5296_v59  ;;  %4202 = vmatprep.subr.bf16.mxu1 %v5299_v32  ;;  %v2339_v48 = vmax.f32 %v4901_v0, 0.0  ;;  %v5335_v51 = vld [vmem:[#allocation8 + $0x6ac] ss:$16 sps:$4 sm:$0xff]   ;;  %v5330_v52 = vld [vmem:[#allocation8 + $0x6a0] ss:$16 sps:$4 sm:$0xff]  }
 0x2e6   :  { %v2346_v17 = vmax.f32 %v4902_v7, 0.0  ;;  %v2345_v18 = vmax.f32 %v4899_v8, 0.0  ;;  %v5338_v54 = vld [vmem:[#allocation8 + $0x6c4] ss:$16 sps:$4 sm:$0xff]   ;;  %v5341_v55 = vld [vmem:[#allocation8 + $0x6cc] ss:$16 sps:$4 sm:$0xff]  }
 0x2e7   :  { %v2352_v19 = vpack.c.bf16 %v2344_v42, %v2336_v12  ;;  %v2347_v20 = vmax.f32 %v4903_v4, 0.0  ;;  %v5336_v56 = vld [vmem:[#allocation8 + $0x6c0] ss:$16 sps:$4 sm:$0xff]   ;;  %v5339_v57 = vld [vmem:[#allocation8 + $0x6c8] ss:$16 sps:$4 sm:$0xff]  }
 0x2e8   :  { %v5682_v21 = vpack.c.bf16 %v2346_v17, %v2338_v15  ;;  %v2353_v22 = vpack.c.bf16 %v2345_v18, %v2337_v16  ;;  %4031 = vmatpush1.bf16.msra.mxu0 %v5294_v10  ;;  %4203 = vmatpush1.bf16.msra.mxu1 %v5297_v11  ;;  %v5347_v59 = vld [vmem:[#allocation8 + $0x6ec] ss:$16 sps:$4 sm:$0xff]   ;;  %v5342_v32 = vld [vmem:[#allocation8 + $0x6e0] ss:$16 sps:$4 sm:$0xff]   ;;  %v5345_v60 = vld [vmem:[#allocation8 + $0x6e8] ss:$16 sps:$4 sm:$0xff]  }
 0x2e9   :  { %v2355_v25 = vpack.c.bf16 %v2347_v20, %v2339_v48  ;;  %4043 = vmatprep.subr.bf16.mxu0 %v5302_v13  ;;  %4215 = vmatprep.subr.bf16.mxu1 %v5305_v14  ;;  %v5350_v62 = vld [vmem:[#allocation8 + $0x704] ss:$16 sps:$4 sm:$0xff]   ;;  %v5353_v63 = vld [vmem:[#allocation8 + $0x70c] ss:$16 sps:$4 sm:$0xff]   ;;  %v5348_v5 = vld [vmem:[#allocation8 + $0x700] ss:$16 sps:$4 sm:$0xff]  }
 0x2ea   :  { %4032 = vmatprep.mubr.bf16.mxu0 %v2353_v22  ;;  %4204 = vmatprep.mubr.bf16.mxu1 %v2353_v22  ;;  %v5351_v0 = vld [vmem:[#allocation8 + $0x708] ss:$16 sps:$4 sm:$0xff]   ;;  %v5356_v1 = vld [vmem:[#allocation8 + $0x724] ss:$16 sps:$4 sm:$0xff]   ;;  %v5359_v6 = vld [vmem:[#allocation8 + $0x72c] ss:$16 sps:$4 sm:$0xff]  }
 0x2eb   :  { %4033 = vmatmul.mubr.bf16.vlgmr.msra.gmra.mrb[12].mxu0 %v2352_v19  ;;  %4205 = vmatmul.mubr.bf16.vlgmr.msra.gmra.mrb[12].mxu1 %v2352_v19  ;;  %v5354_v2 = vld [vmem:[#allocation8 + $0x720] ss:$16 sps:$4 sm:$0xff]   ;;  %v5357_v7 = vld [vmem:[#allocation8 + $0x728] ss:$16 sps:$4 sm:$0xff]   ;;  %v5362_v8 = vld [vmem:[#allocation8 + $0x744] ss:$16 sps:$4 sm:$0xff]  }
 0x2ec   :  { %4044 = vmatpush1.bf16.msra.mxu0 %v5300_v23  ;;  %4216 = vmatpush1.bf16.msra.mxu1 %v5303_v24  ;;  %v5365_v9 = vld [vmem:[#allocation8 + $0x74c] ss:$16 sps:$4 sm:$0xff]   ;;  %v5360_v10 = vld [vmem:[#allocation8 + $0x740] ss:$16 sps:$4 sm:$0xff]   ;;  %v5363_v11 = vld [vmem:[#allocation8 + $0x748] ss:$16 sps:$4 sm:$0xff]  }
 0x2ed   :  { %4075 = vmatprep.mubr.bf16.mxu0 %v2355_v25  ;;  %4247 = vmatprep.mubr.bf16.mxu1 %v2355_v25  ;;  %v5368_v12 = vld [vmem:[#allocation8 + $0x764] ss:$16 sps:$4 sm:$0xff]   ;;  %v5371_v42 = vld [vmem:[#allocation8 + $0x76c] ss:$16 sps:$4 sm:$0xff]   ;;  %v5366_v4 = vld [vmem:[#allocation8 + $0x760] ss:$16 sps:$4 sm:$0xff]  }
 0x2ee   :  { %4045 = vmatprep.subr.bf16.mxu0 %v5308_v26  ;;  %4217 = vmatprep.subr.bf16.mxu1 %v5311_v27  ;;  %v5369_v13 = vld [vmem:[#allocation8 + $0x768] ss:$16 sps:$4 sm:$0xff]   ;;  %v5374_v14 = vld [vmem:[#allocation8 + $0x784] ss:$16 sps:$4 sm:$0xff]   ;;  %v5377_v15 = vld [vmem:[#allocation8 + $0x78c] ss:$16 sps:$4 sm:$0xff]  }
 0x2ef   :  { %v5372_v16 = vld [vmem:[#allocation8 + $0x780] ss:$16 sps:$4 sm:$0xff]   ;;  %v5375_v17 = vld [vmem:[#allocation8 + $0x788] ss:$16 sps:$4 sm:$0xff]   ;;  %v5380_v18 = vld [vmem:[#allocation8 + $0x7a4] ss:$16 sps:$4 sm:$0xff]  }
 0x2f0   :  { %4046 = vmatpush1.bf16.msra.mxu0 %v5306_v28  ;;  %4218 = vmatpush1.bf16.msra.mxu1 %v5309_v29  ;;  %v5383_v48 = vld [vmem:[#allocation8 + $0x7ac] ss:$16 sps:$4 sm:$0xff]   ;;  %v5378_v19 = vld [vmem:[#allocation8 + $0x7a0] ss:$16 sps:$4 sm:$0xff]   ;;  %v5381_v20 = vld [vmem:[#allocation8 + $0x7a8] ss:$16 sps:$4 sm:$0xff]  }
 0x2f1   :  { %4047 = vmatprep.subr.bf16.mxu0 %v5314_v30  ;;  %4219 = vmatprep.subr.bf16.mxu1 %v5317_v31  ;;  %v5386_v22 = vld [vmem:[#allocation8 + $0x7c4] ss:$16 sps:$4 sm:$0xff]   ;;  %v5389_v23 = vld [vmem:[#allocation8 + $0x7cc] ss:$16 sps:$4 sm:$0xff]   ;;  %v5384_v24 = vld [vmem:[#allocation8 + $0x7c0] ss:$16 sps:$4 sm:$0xff]  }
 0x2f2   :  { %v5387_v25 = vld [vmem:[#allocation8 + $0x7c8] ss:$16 sps:$4 sm:$0xff]   ;;  %v5392_v26 = vld [vmem:[#allocation8 + $0x7e4] ss:$16 sps:$4 sm:$0xff]   ;;  %v5395_v27 = vld [vmem:[#allocation8 + $0x7ec] ss:$16 sps:$4 sm:$0xff]  }
 0x2f3   :  { %v5390_v28 = vld [vmem:[#allocation8 + $0x7e0] ss:$16 sps:$4 sm:$0xff]   ;;  %v5393_v29 = vld [vmem:[#allocation8 + $0x7e8] ss:$16 sps:$4 sm:$0xff]  }
 0x2f4   :  { %4048 = vmatpush1.bf16.msra.mxu0 %v5312_v33  ;;  %4220 = vmatpush1.bf16.msra.mxu1 %v5315_v34  ;;  %v4266_v30 = vld [vmem:[%s5719_s7] sm:$0xf] }
 0x2f5   :  { %4049 = vmatprep.subr.bf16.mxu0 %v5320_v35  ;;  %4221 = vmatprep.subr.bf16.mxu1 %v5323_v38  ;;  %v4267_v31 = vunpack.c.l.bf16 %v4266_v30  ;;  %v2612_v33 = vld [vmem:[%s5718_s6] sm:$0xf] }
 0x2f6   :  { %v2617_v35 = vrot.slane %v2612_v33, %v5611_v45 }
 0x2f7   :  { %v4280_v34 = vrot.slane %v4267_v31, %v686_v36  ;;  %v4272_v38 = vrot.slane %v4267_v31, %v5611_v45 }
 0x2f8   :  { %4050 = vmatpush1.bf16.msra.mxu0 %v5318_v39  ;;  %4222 = vmatpush1.bf16.msra.mxu1 %v5321_v40  ;;  %v2625_v39 = vrot.slane %v2612_v33, %v5622_v61  ;;  %v2621_v40 = vrot.slane %v2612_v33, %v5617_v47 }
 0x2f9   :  { %4051 = vmatprep.subr.bf16.mxu0 %v5326_v41  ;;  %4223 = vmatprep.subr.bf16.mxu1 %v5329_v43  ;;  %v4276_v41 = vrot.slane %v4267_v31, %v5622_v61  ;;  %v2629_v43 = vrot.slane %v2612_v33, %v5625_v3  ;;  %v4292_v36 = vrot.slane %v4272_v38, %v5611_v45 }
 0x2fb   :  { %v4296_v44 = vrot.slane %v4276_v41, %v5611_v45 }
 0x2fc   :  { %4052 = vmatpush1.bf16.msra.mxu0 %v5324_v46  ;;  %4224 = vmatpush1.bf16.msra.mxu1 %v5327_v49 }
 0x2fd   :  { %4053 = vmatprep.subr.bf16.mxu0 %v5332_v50  ;;  %4225 = vmatprep.subr.bf16.mxu1 %v5335_v51 }
 0x300   :  { %4054 = vmatpush1.bf16.msra.mxu0 %v5330_v52  ;;  %4226 = vmatpush1.bf16.msra.mxu1 %v5333_v53  ;;  %v4300_v52 = vrot.slane %v4280_v34, %v5611_v45 }
 0x301   :  { %4055 = vmatprep.subr.bf16.mxu0 %v5338_v54  ;;  %4227 = vmatprep.subr.bf16.mxu1 %v5341_v55 }
 0x304   :  { %4056 = vmatpush1.bf16.msra.mxu0 %v5336_v56  ;;  %4228 = vmatpush1.bf16.msra.mxu1 %v5339_v57 }
 0x305   :  { %4057 = vmatprep.subr.bf16.mxu0 %v5344_v58  ;;  %4229 = vmatprep.subr.bf16.mxu1 %v5347_v59 }
 0x308   :  { %4058 = vmatpush1.bf16.msra.mxu0 %v5342_v32  ;;  %4230 = vmatpush1.bf16.msra.mxu1 %v5345_v60 }
 0x309   :  { %4059 = vmatprep.subr.bf16.mxu0 %v5350_v62  ;;  %4231 = vmatprep.subr.bf16.mxu1 %v5353_v63 }
 0x30c   :  { %4060 = vmatpush1.bf16.msra.mxu0 %v5348_v5  ;;  %4232 = vmatpush1.bf16.msra.mxu1 %v5351_v0 }
 0x30d   :  { %4061 = vmatprep.subr.bf16.mxu0 %v5356_v1  ;;  %4233 = vmatprep.subr.bf16.mxu1 %v5359_v6 }
 0x310   :  { %4062 = vmatpush1.bf16.msra.mxu0 %v5354_v2  ;;  %4234 = vmatpush1.bf16.msra.mxu1 %v5357_v7 }
 0x311   :  { %4063 = vmatprep.subr.bf16.mxu0 %v5362_v8  ;;  %4235 = vmatprep.subr.bf16.mxu1 %v5365_v9 }
 0x314   :  { %4064 = vmatpush1.bf16.msra.mxu0 %v5360_v10  ;;  %4236 = vmatpush1.bf16.msra.mxu1 %v5363_v11 }
 0x315   :  { %4065 = vmatprep.subr.bf16.mxu0 %v5368_v12  ;;  %4237 = vmatprep.subr.bf16.mxu1 %v5371_v42 }
 0x318   :  { %4066 = vmatpush1.bf16.msra.mxu0 %v5366_v4  ;;  %4238 = vmatpush1.bf16.msra.mxu1 %v5369_v13 }
 0x319   :  { %4067 = vmatprep.subr.bf16.mxu0 %v5374_v14  ;;  %4239 = vmatprep.subr.bf16.mxu1 %v5377_v15 }
 0x31c   :  { %4068 = vmatpush1.bf16.msra.mxu0 %v5372_v16  ;;  %4240 = vmatpush1.bf16.msra.mxu1 %v5375_v17 }
 0x31d   :  { %4069 = vmatprep.subr.bf16.mxu0 %v5380_v18  ;;  %4241 = vmatprep.subr.bf16.mxu1 %v5383_v48  ;;  %v4887_v48 = vld [vmem:[#allocation2] ss:$0 sm:$0xff] }
 0x320   :  { %4070 = vmatpush1.bf16.msra.mxu0 %v5378_v19  ;;  %4242 = vmatpush1.bf16.msra.mxu1 %v5381_v20 }
 0x321   :  { %4071 = vmatprep.subr.bf16.mxu0 %v5386_v22  ;;  %4243 = vmatprep.subr.bf16.mxu1 %v5389_v23 }
 0x324   :  { %4072 = vmatpush1.bf16.msra.mxu0 %v5384_v24  ;;  %4244 = vmatpush1.bf16.msra.mxu1 %v5387_v25 }
 0x325   :  { %4073 = vmatprep.subr.bf16.mxu0 %v5392_v26  ;;  %4245 = vmatprep.subr.bf16.mxu1 %v5395_v27 }
 0x328   :  { %4074 = vmatpush1.bf16.msra.mxu0 %v5390_v28  ;;  %4246 = vmatpush1.bf16.msra.mxu1 %v5393_v29 }
 0x32b   :  { %4076 = vmatmul.mubr.bf16.vlgmr.msra.gmra.mrb[12].mxu0 %v5682_v21  ;;  %4248 = vmatmul.mubr.bf16.vlgmr.msra.gmra.mrb[12].mxu1 %v5682_v21  ;;  %v4284_v21 = vrot.slane %v4267_v31, %v694_v37 }
 0x32d   :  { %v4304_v61 = vrot.slane %v4284_v21, %v5611_v45 }
 0x3fe   :  { %v4077_v46 = vpop.f32.mrb[12].mxu0  ;;  %v4249_v49 = vpop.f32.mrb[12].mxu1 }
 0x3ff   :  { %v4904_v50 = vadd.f32 %v4077_v46, %v2617_v35  ;;  %v4908_v51 = vadd.f32 %v4249_v49, %v2625_v39  ;;  %v4079_v53 = vpop.f32.mrb[13].mxu0  ;;  %v4251_v54 = vpop.f32.mrb[13].mxu1 }
 0x400   :  { %v4905_v55 = vadd.f32 %v4079_v53, %v2621_v40  ;;  %v4909_v37 = vadd.f32 %v4251_v54, %v2629_v43  ;;  %v4081_v56 = vpop.f32.mrb[14].mxu0  ;;  %v4253_v47 = vpop.f32.mrb[14].mxu1 }
 0x401   :  { %v4258_v57 = vmax.f32 %v4904_v50, 0.0  ;;  %v4260_v3 = vmax.f32 %v4908_v51, 0.0  ;;  %v4906_v58 = vadd.f32 %v4081_v56, %v2617_v35  ;;  %v4910_v59 = vadd.f32 %v4253_v47, %v2625_v39  ;;  %v4083_v32 = vpop.f32.mrb[15].mxu0  ;;  %v4255_v60 = vpop.f32.mrb[15].mxu1 }
 0x402   :  { %v4259_v62 = vmax.f32 %v4905_v55, 0.0  ;;  %v4261_v63 = vmax.f32 %v4909_v37, 0.0  ;;  %v4907_v5 = vadd.f32 %v4083_v32, %v2621_v40  ;;  %v4911_v0 = vadd.f32 %v4255_v60, %v2629_v43 }
 0x403   :  { %v4305_v1 = vmul.f32 %v4292_v36, %v4258_v57  ;;  %v4307_v6 = vmul.f32 %v4300_v52, %v4260_v3  ;;  %v4262_v2 = vmax.f32 %v4906_v58, 0.0  ;;  %v4264_v7 = vmax.f32 %v4910_v59, 0.0 }
 0x404   :  { %v4306_v8 = vmul.f32 %v4296_v44, %v4259_v62  ;;  %v4263_v9 = vmax.f32 %v4907_v5, 0.0  ;;  %v4265_v10 = vmax.f32 %v4911_v0, 0.0  ;;  %v4308_v11 = vmul.f32 %v4304_v61, %v4261_v63 }
 0x405   :  { %v4309_v12 = vmul.f32 %v4292_v36, %v4262_v2  ;;  %v4311_v45 = vmul.f32 %v4300_v52, %v4264_v7 }
 0x406   :  { %v4310_v42 = vmul.f32 %v4296_v44, %v4263_v9  ;;  %v4312_v4 = vmul.f32 %v4304_v61, %v4265_v10  ;;  %v4313_v13 = vadd.f32 %v4306_v8, %v4305_v1 }
 0x408   :  { %v4318_v14 = vadd.f32 %v4310_v42, %v4309_v12  ;;  %v4314_v15 = vadd.f32 %v4313_v13, %v4307_v6 }
 0x40a   :  { %v4315_v16 = vadd.f32 %v4314_v15, %v4308_v11  ;;  %v4319_v17 = vadd.f32 %v4318_v14, %v4311_v45 }
 0x40c   :  { %4316 = vadd.xlane.f32.xlu0 %v4315_v16  ;;  %v4320_v18 = vadd.f32 %v4319_v17, %v4312_v4 }
 0x410   :  { %4321 = vadd.xlane.f32.xlu0 %v4320_v18 }
 0x499   :  { %v4317_v19 = vpop.xlane.xlu0 %4316 }
 0x49a   :  { %v4330_v20 = vadd.f32 %v4887_v48, %v4317_v19 }
 0x49c   :  { %4333 = vst.msk [vmem:[%s5721_s9] sm:$0xff] %vm4332_vm0, %v4330_v20 }
 0x49d   :  { %v4322_v22 = vpop.xlane.xlu0 %4321 }
 0x49e   :  { %v4331_v23 = vadd.f32 %v4887_v48, %v4322_v22 }
 0x4a0   :  { %4334 = vst.msk [vmem:[%s5721_s9 + $0x8] sm:$0xff] %vm4332_vm0, %v4331_v23 }
 0x4a1   :  { %4339 = vsyncpa [#allocation4], 1 }
 0x4a2   :  { %4340 = vsyncpa [#allocation6], 1 }
 0x4a3   :  { %4341 = vsyncpa [#allocation9], 1 }

</bundles_post_ra>
